<compile_context>
chip_gen: v7x
topology: tpu7x:2x2x1
jax: 0.10.0
libtpu: 0.0.40
codegen_flags: <defaults>
</compile_context>

<pallas_src>
import functools

import jax
import jax.numpy as jnp
from jax.experimental import pallas as pl
from jax.experimental.pallas import tpu as pltpu

EMBEDDING_DIM = 256
HIDDEN_DIM = 128


def _mlp_kernel(x_ref, w1_ref, b1_ref, w2_ref, b2_ref, w3_ref, b3_ref, o_ref):
    # Layer 1: embedding = relu(x @ W1 + b1)   (bf16 x f32-accumulate)
    h = jnp.dot(x_ref[...], w1_ref[...], preferred_element_type=jnp.float32)
    h = jnp.maximum(h + b1_ref[...], 0.0)
    # Layer 2: fc = relu(h @ W2 + b2)
    h = jnp.dot(h.astype(w2_ref.dtype), w2_ref[...],
                preferred_element_type=jnp.float32)
    h = jnp.maximum(h + b2_ref[...], 0.0)
    # Layer 3: logits = h @ W3 + b3, then sigmoid (computed in f32)
    logits = jnp.dot(h.astype(w3_ref.dtype), w3_ref[...],
                     preferred_element_type=jnp.float32)
    logits = logits + b3_ref[...]
    o_ref[...] = jax.nn.sigmoid(logits).astype(o_ref.dtype)


def _default_block_b():
    """128 rows already fill the v5e MXU (4x128x128); 256 for v6e/v7x."""
    try:
        kind = jax.devices()[0].device_kind.lower()
    except Exception:  # pragma: no cover - defensive only
        kind = ""
    return 128 if "v5" in kind else 256


@functools.partial(jax.jit, static_argnames=("block_b", "compute_dtype", "out_dtype"))
def _imputation_forward_impl(x, w1, b1, w2, b2, w3, b3, *,
                             block_b, compute_dtype, out_dtype):
    B, V_in = x.shape
    V_emb = w1.shape[1]
    V_hid = w2.shape[1]
    V_out = w3.shape[1]

    # Pad the batch up to a multiple of the tile; padded rows are discarded.
    B_pad = ((B + block_b - 1) // block_b) * block_b
    if B_pad != B:
        x = jnp.pad(x, ((0, B_pad - B), (0, 0)))

    # bf16 storage for matmul operands (halves HBM/VMEM traffic, native MXU
    # rate); biases stay f32 and are added after f32 accumulation.
    xc = x.astype(compute_dtype)
    w1c = w1.astype(compute_dtype)
    w2c = w2.astype(compute_dtype)
    w3c = w3.astype(compute_dtype)
    b1c = b1.astype(jnp.float32)
    b2c = b2.astype(jnp.float32)
    b3c = b3.astype(jnp.float32)

    grid = (B_pad // block_b,)

    in_bytes = jnp.dtype(compute_dtype).itemsize
    out_bytes = jnp.dtype(out_dtype).itemsize
    weight_elems = V_in * V_emb + V_emb * V_hid + V_hid * V_out
    cost = pl.CostEstimate(
        flops=2 * B_pad * weight_elems,
        transcendentals=B_pad * V_out,  # exp inside sigmoid
        bytes_accessed=(B_pad * V_in * in_bytes
                        + weight_elems * in_bytes
                        + (V_emb + V_hid + V_out) * 4
                        + B_pad * V_out * out_bytes),
    )

    out = pl.pallas_call(
        _mlp_kernel,
        out_shape=jax.ShapeDtypeStruct((B_pad, V_out), out_dtype),
        grid=grid,
        in_specs=[
            # batch tile of the input (lane-dense feature dim)
            pl.BlockSpec((block_b, V_in), lambda i: (i, 0)),
            # weights / biases: fully resident, constant block across the grid
            pl.BlockSpec((V_in, V_emb), lambda i: (0, 0)),
            pl.BlockSpec((1, V_emb), lambda i: (0, 0)),
            pl.BlockSpec((V_emb, V_hid), lambda i: (0, 0)),
            pl.BlockSpec((1, V_hid), lambda i: (0, 0)),
            pl.BlockSpec((V_hid, V_out), lambda i: (0, 0)),
            pl.BlockSpec((1, V_out), lambda i: (0, 0)),
        ],
        out_specs=pl.BlockSpec((block_b, V_out), lambda i: (i, 0)),
        compiler_params=pltpu.CompilerParams(
            dimension_semantics=("parallel",),  # batch axis shards across TCs on v7x
        ),
        cost_estimate=cost,
    )(xc, w1c, b1c, w2c, b2c, w3c, b3c)

    return out[:B]


def imputation_model_forward(x, w1, b1, w2, b2, w3, b3, *,
                             block_b=None,
                             compute_dtype=jnp.bfloat16,
                             out_dtype=jnp.float32):
    """Fused forward pass. x: [B, V_diag] float -> probs [B, V_out]."""
    if block_b is None:
        block_b = _default_block_b()
    return _imputation_forward_impl(
        x, w1, b1, w2, b2, w3, b3,
        block_b=block_b, compute_dtype=compute_dtype, out_dtype=out_dtype)


def _init_linear(key, fan_in, fan_out):
    """PyTorch nn.Linear-style init: U(-1/sqrt(fan_in), 1/sqrt(fan_in)).
    Returns (W [fan_in, fan_out], b [1, fan_out])."""
    kw, kb = jax.random.split(key)
    bound = 1.0 / jnp.sqrt(jnp.float32(fan_in))
    w = jax.random.uniform(kw, (fan_in, fan_out), jnp.float32, -bound, bound)
    b = jax.random.uniform(kb, (1, fan_out), jnp.float32, -bound, bound)
    return w, b


def _reference_forward_f32(x, w1, b1, w2, b2, w3, b3):
    h = jnp.maximum(x @ w1 + b1, 0.0)
    h = jnp.maximum(h @ w2 + b2, 0.0)
    return jax.nn.sigmoid(h @ w3 + b3)


def _reference_forward_mixed(x, w1, b1, w2, b2, w3, b3, compute_dtype=jnp.bfloat16):
    """Mirrors the kernel's bf16-compute / f32-accumulate numerics."""
    cd = compute_dtype
    h = jnp.dot(x.astype(cd), w1.astype(cd), preferred_element_type=jnp.float32)
    h = jnp.maximum(h + b1, 0.0)
    h = jnp.dot(h.astype(cd), w2.astype(cd), preferred_element_type=jnp.float32)
    h = jnp.maximum(h + b2, 0.0)
    logits = jnp.dot(h.astype(cd), w3.astype(cd),
                     preferred_element_type=jnp.float32) + b3
    return jax.nn.sigmoid(logits)


if __name__ == "__main__":
    # Small, deterministic config (stand-in for MediSimConfig vocab sizes).
    DIAGNOSIS_VOCAB = 384
    PROCEDURE_VOCAB = 128
    MEDICATION_VOCAB = 128
    OUT_DIM = PROCEDURE_VOCAB + MEDICATION_VOCAB
    BATCH = 8

    key = jax.random.PRNGKey(0)
    k_x, k1, k2, k3 = jax.random.split(key, 4)

    # Multi-hot-like diagnosis input (0/1 floats, exactly representable in bf16).
    x = (jax.random.uniform(k_x, (BATCH, DIAGNOSIS_VOCAB)) < 0.05).astype(jnp.float32)

    w1, b1 = _init_linear(k1, DIAGNOSIS_VOCAB, EMBEDDING_DIM)   # embedding
    w2, b2 = _init_linear(k2, EMBEDDING_DIM, HIDDEN_DIM)        # fc
    w3, b3 = _init_linear(k3, HIDDEN_DIM, OUT_DIM)              # output

    probs = imputation_model_forward(x, w1, b1, w2, b2, w3, b3)
    probs = jax.block_until_ready(probs)

    ref_mixed = _reference_forward_mixed(x, w1, b1, w2, b2, w3, b3)
    ref_f32 = _reference_forward_f32(x, w1, b1, w2, b2, w3, b3)

    assert probs.shape == (BATCH, OUT_DIM)
    # Tight check vs. a reference using identical bf16/f32 mixed precision.
    assert jnp.allclose(probs, ref_mixed, atol=1e-3, rtol=1e-3), \
        "mismatch vs mixed-precision JAX reference"
    # Loose check vs. the full-f32 reference (bf16 quantization of weights).
    assert jnp.allclose(probs, ref_f32, atol=3e-2, rtol=3e-2), \
        "mismatch vs f32 JAX reference"

    print("KERNEL_OK")
</pallas_src>

<mosaic_0001>
module attributes {stable_mosaic.version = 11 : i64} {
  func.func @_mlp_kernel(%arg0: i32, %arg1: memref<256x384xbf16, #tpu.memory_space<vmem>>, %arg2: memref<384x256xbf16, #tpu.memory_space<vmem>>, %arg3: memref<1x256xf32, #tpu.memory_space<vmem>>, %arg4: memref<256x128xbf16, #tpu.memory_space<vmem>>, %arg5: memref<1x128xf32, #tpu.memory_space<vmem>>, %arg6: memref<128x256xbf16, #tpu.memory_space<vmem>>, %arg7: memref<1x256xf32, #tpu.memory_space<vmem>>, %arg8: memref<256x256xf32, #tpu.memory_space<vmem>>) attributes {dimension_semantics = [#tpu.dimension_semantics<parallel>], iteration_bounds = array<i64: 1>, scalar_prefetch = 0 : i64, scratch_operands = 0 : i64, tpu.core_type = #tpu.core_type<tc>, window_params = [{transform_indices = @transform_0, window_bounds = array<i64: 256, 384>}, {pipeline_mode = #tpu.pipeline_mode<synchronous>, transform_indices = @transform_1, window_bounds = array<i64: 384, 256>}, {pipeline_mode = #tpu.pipeline_mode<synchronous>, transform_indices = @transform_2, window_bounds = array<i64: 1, 256>}, {pipeline_mode = #tpu.pipeline_mode<synchronous>, transform_indices = @transform_3, window_bounds = array<i64: 256, 128>}, {pipeline_mode = #tpu.pipeline_mode<synchronous>, transform_indices = @transform_4, window_bounds = array<i64: 1, 128>}, {pipeline_mode = #tpu.pipeline_mode<synchronous>, transform_indices = @transform_5, window_bounds = array<i64: 128, 256>}, {pipeline_mode = #tpu.pipeline_mode<synchronous>, transform_indices = @transform_6, window_bounds = array<i64: 1, 256>}, {transform_indices = @transform_7, window_bounds = array<i64: 256, 256>}]} {
    %c0 = arith.constant 0 : index
    %c0_0 = arith.constant 0 : index
    %0 = vector.load %arg1[%c0, %c0_0] : memref<256x384xbf16, #tpu.memory_space<vmem>>, vector<256x384xbf16>
    %c0_1 = arith.constant 0 : index
    %c0_2 = arith.constant 0 : index
    %1 = vector.load %arg2[%c0_1, %c0_2] : memref<384x256xbf16, #tpu.memory_space<vmem>>, vector<384x256xbf16>
    %cst = arith.constant dense<0.000000e+00> : vector<256x256xf32>
    %2 = tpu.matmul %0, %1, %cst {dimension_numbers = #tpu.dot_dimension_numbers<[1], [0], [0], [1], [0, 0, 1, 1], [], []>} : vector<256x384xbf16>, vector<384x256xbf16>, vector<256x256xf32> -> vector<256x256xf32>
    %c0_3 = arith.constant 0 : index
    %c0_4 = arith.constant 0 : index
    %3 = vector.load %arg3[%c0_3, %c0_4] : memref<1x256xf32, #tpu.memory_space<vmem>>, vector<1x256xf32>
    %4 = vector.broadcast %3 : vector<1x256xf32> to vector<256x256xf32>
    %5 = arith.addf %2, %4 : vector<256x256xf32>
    %cst_5 = arith.constant 0.000000e+00 : f32
    %6 = vector.broadcast %cst_5 : f32 to vector<256x256xf32>
    %7 = arith.maximumf %5, %6 : vector<256x256xf32>
    %8 = arith.truncf %7 : vector<256x256xf32> to vector<256x256xbf16>
    %c0_6 = arith.constant 0 : index
    %c0_7 = arith.constant 0 : index
    %9 = vector.load %arg4[%c0_6, %c0_7] : memref<256x128xbf16, #tpu.memory_space<vmem>>, vector<256x128xbf16>
    %cst_8 = arith.constant dense<0.000000e+00> : vector<256x128xf32>
    %10 = tpu.matmul %8, %9, %cst_8 {dimension_numbers = #tpu.dot_dimension_numbers<[1], [0], [0], [1], [0, 0, 1, 1], [], []>} : vector<256x256xbf16>, vector<256x128xbf16>, vector<256x128xf32> -> vector<256x128xf32>
    %c0_9 = arith.constant 0 : index
    %c0_10 = arith.constant 0 : index
    %11 = vector.load %arg5[%c0_9, %c0_10] : memref<1x128xf32, #tpu.memory_space<vmem>>, vector<1x128xf32>
    %12 = vector.broadcast %11 : vector<1x128xf32> to vector<256x128xf32>
    %13 = arith.addf %10, %12 : vector<256x128xf32>
    %cst_11 = arith.constant 0.000000e+00 : f32
    %14 = vector.broadcast %cst_11 : f32 to vector<256x128xf32>
    %15 = arith.maximumf %13, %14 : vector<256x128xf32>
    %16 = arith.truncf %15 : vector<256x128xf32> to vector<256x128xbf16>
    %c0_12 = arith.constant 0 : index
    %c0_13 = arith.constant 0 : index
    %17 = vector.load %arg6[%c0_12, %c0_13] : memref<128x256xbf16, #tpu.memory_space<vmem>>, vector<128x256xbf16>
    %cst_14 = arith.constant dense<0.000000e+00> : vector<256x256xf32>
    %18 = tpu.matmul %16, %17, %cst_14 {dimension_numbers = #tpu.dot_dimension_numbers<[1], [0], [0], [1], [0, 0, 1, 1], [], []>} : vector<256x128xbf16>, vector<128x256xbf16>, vector<256x256xf32> -> vector<256x256xf32>
    %c0_15 = arith.constant 0 : index
    %c0_16 = arith.constant 0 : index
    %19 = vector.load %arg7[%c0_15, %c0_16] : memref<1x256xf32, #tpu.memory_space<vmem>>, vector<1x256xf32>
    %20 = vector.broadcast %19 : vector<1x256xf32> to vector<256x256xf32>
    %21 = arith.addf %18, %20 : vector<256x256xf32>
    %22 = arith.negf %21 : vector<256x256xf32>
    %23 = math.exp %22 : vector<256x256xf32>
    %cst_17 = arith.constant 1.000000e+00 : f32
    %24 = vector.broadcast %cst_17 : f32 to vector<256x256xf32>
    %25 = arith.addf %24, %23 : vector<256x256xf32>
    %26 = arith.divf %24, %25 : vector<256x256xf32>
    %c0_18 = arith.constant 0 : index
    %c0_19 = arith.constant 0 : index
    %27 = vector.load %arg8[%c0_18, %c0_19] : memref<256x256xf32, #tpu.memory_space<vmem>>, vector<256x256xf32>
    tpu.vector_store %arg8[%c0_18, %c0_19], %26 {strides = array<i32>} : memref<256x256xf32, #tpu.memory_space<vmem>>, vector<256x256xf32>,
    return
  }
  func.func @transform_0(%arg0: i32) -> (i32, i32) {
    %c0_i32 = arith.constant 0 : i32
    %c0_i32_0 = arith.constant 0 : i32
    return %arg0, %c0_i32 : i32, i32
  }
  func.func @transform_1(%arg0: i32) -> (i32, i32) {
    %c0_i32 = arith.constant 0 : i32
    %c0_i32_0 = arith.constant 0 : i32
    %c0_i32_1 = arith.constant 0 : i32
    return %c0_i32, %c0_i32_0 : i32, i32
  }
  func.func @transform_2(%arg0: i32) -> (i32, i32) {
    %c0_i32 = arith.constant 0 : i32
    %c0_i32_0 = arith.constant 0 : i32
    %c0_i32_1 = arith.constant 0 : i32
    return %c0_i32, %c0_i32_0 : i32, i32
  }
  func.func @transform_3(%arg0: i32) -> (i32, i32) {
    %c0_i32 = arith.constant 0 : i32
    %c0_i32_0 = arith.constant 0 : i32
    %c0_i32_1 = arith.constant 0 : i32
    return %c0_i32, %c0_i32_0 : i32, i32
  }
  func.func @transform_4(%arg0: i32) -> (i32, i32) {
    %c0_i32 = arith.constant 0 : i32
    %c0_i32_0 = arith.constant 0 : i32
    %c0_i32_1 = arith.constant 0 : i32
    return %c0_i32, %c0_i32_0 : i32, i32
  }
  func.func @transform_5(%arg0: i32) -> (i32, i32) {
    %c0_i32 = arith.constant 0 : i32
    %c0_i32_0 = arith.constant 0 : i32
    %c0_i32_1 = arith.constant 0 : i32
    return %c0_i32, %c0_i32_0 : i32, i32
  }
  func.func @transform_6(%arg0: i32) -> (i32, i32) {
    %c0_i32 = arith.constant 0 : i32
    %c0_i32_0 = arith.constant 0 : i32
    %c0_i32_1 = arith.constant 0 : i32
    return %c0_i32, %c0_i32_0 : i32, i32
  }
  func.func @transform_7(%arg0: i32) -> (i32, i32) {
    %c0_i32 = arith.constant 0 : i32
    %c0_i32_0 = arith.constant 0 : i32
    return %arg0, %c0_i32 : i32, i32
  }
}

</mosaic_0001>

<bundles_post_ra>
// kernel: _imputation_forward_impl.1
= control target key start
LH: loop header
LB: loop body
LE: loop exit
PB: predicated region body
PF: predicated region fallthrough
CT: control target
= control target key end

     0   :  { %s3932_s1 = inlined_call_operand.vmem [shape: bf16[384,256], index: 1, kind: input, shape index: {}]   ;;  %s3933_s0 = inlined_call_operand.vmem [shape: bf16[256,384], index: 0, kind: input, shape index: {}]   ;;  %s3934_s3 = inlined_call_operand.vmem [shape: bf16[256,128], index: 3, kind: input, shape index: {}]   ;;  %s3935_s5 = inlined_call_operand.vmem [shape: bf16[128,256], index: 5, kind: input, shape index: {}]   ;;  %s3936_s2 = inlined_call_operand.vmem [shape: f32[1,256], index: 2, kind: input, shape index: {}]   ;;  %s3937_s4 = inlined_call_operand.vmem [shape: f32[1,128], index: 4, kind: input, shape index: {}]   ;;  %s3938_s6 = inlined_call_operand.vmem [shape: f32[1,256], index: 6, kind: input, shape index: {}]   ;;  %s3939_s7 = inlined_call_operand.vmem [shape: f32[256,256], index: 7, kind: output, shape index: {}]  }
   0x1   :  { %v2660_v0 = vld [vmem:[%s3932_s1 + $0x4] ss:$8 sps:$4 sm:$0xff]   ;;  %v2662_v1 = vld [vmem:[%s3932_s1] ss:$8 sps:$4 sm:$0xff]   ;;  %v2663_v2 = vld [vmem:[%s3932_s1 + $0x14] ss:$8 sps:$4 sm:$0xff]  }
   0x2   :  { %647 = vmatprep.subr.bf16.mxu0 %v2660_v0  ;;  %v2665_v3 = vld [vmem:[%s3932_s1 + $0x10] ss:$8 sps:$4 sm:$0xff]   ;;  %v2666_v4 = vld [vmem:[%s3932_s1 + $0x24] ss:$8 sps:$4 sm:$0xff]   ;;  %v2668_v5 = vld [vmem:[%s3932_s1 + $0x20] ss:$8 sps:$4 sm:$0xff]  }
   0x3   :  { %648 = vmatpush1.bf16.msra.mxu0 %v2662_v1  ;;  %v2669_v6 = vld [vmem:[%s3932_s1 + $0x34] ss:$8 sps:$4 sm:$0xff]   ;;  %v2671_v7 = vld [vmem:[%s3932_s1 + $0x30] ss:$8 sps:$4 sm:$0xff]   ;;  %v2672_v8 = vld [vmem:[%s3932_s1 + $0x44] ss:$8 sps:$4 sm:$0xff]  }
   0x4   :  { %649 = vmatprep.subr.bf16.mxu0 %v2663_v2  ;;  %v2674_v9 = vld [vmem:[%s3932_s1 + $0x40] ss:$8 sps:$4 sm:$0xff]   ;;  %v2675_v10 = vld [vmem:[%s3932_s1 + $0x54] ss:$8 sps:$4 sm:$0xff]   ;;  %v2677_v11 = vld [vmem:[%s3932_s1 + $0x50] ss:$8 sps:$4 sm:$0xff]  }
   0x5   :  { %v2678_v12 = vld [vmem:[%s3932_s1 + $0x64] ss:$8 sps:$4 sm:$0xff]   ;;  %v2680_v14 = vld [vmem:[%s3932_s1 + $0x60] ss:$8 sps:$4 sm:$0xff]   ;;  %v2681_v15 = vld [vmem:[%s3932_s1 + $0x74] ss:$8 sps:$4 sm:$0xff]  }
   0x6   :  { %v2710_v13 = vld [vmem:[%s3933_s0 + $0x4] ss:$12 sps:$4 sm:$0xff]   ;;  %v2686_v18 = vld [vmem:[%s3932_s1 + $0x80] ss:$8 sps:$4 sm:$0xff]   ;;  %v2687_v19 = vld [vmem:[%s3932_s1 + $0x94] ss:$8 sps:$4 sm:$0xff]  }
   0x7   :  { %650 = vmatpush1.bf16.msra.mxu0 %v2665_v3  ;;  %679 = vmatprep.mubr.bf16.mxu0 %v2710_v13  ;;  %v2683_v16 = vld [vmem:[%s3932_s1 + $0x70] ss:$8 sps:$4 sm:$0xff]   ;;  %v2684_v17 = vld [vmem:[%s3932_s1 + $0x84] ss:$8 sps:$4 sm:$0xff]   ;;  %v2692_v22 = vld [vmem:[%s3932_s1 + $0xa0] ss:$8 sps:$4 sm:$0xff]  }
   0x8   :  { %651 = vmatprep.subr.bf16.mxu0 %v2666_v4  ;;  %v2689_v20 = vld [vmem:[%s3932_s1 + $0x90] ss:$8 sps:$4 sm:$0xff]   ;;  %v2690_v21 = vld [vmem:[%s3932_s1 + $0xa4] ss:$8 sps:$4 sm:$0xff]   ;;  %v2693_v23 = vld [vmem:[%s3932_s1 + $0xb4] ss:$8 sps:$4 sm:$0xff]  }
   0x9   :  { %v2695_v24 = vld [vmem:[%s3932_s1 + $0xb0] ss:$8 sps:$4 sm:$0xff]   ;;  %v2696_v25 = vld [vmem:[%s3932_s1 + $0xc4] ss:$8 sps:$4 sm:$0xff]   ;;  %v2698_v26 = vld [vmem:[%s3932_s1 + $0xc0] ss:$8 sps:$4 sm:$0xff]  }
   0xa   :  { %v2699_v27 = vld [vmem:[%s3932_s1 + $0xd4] ss:$8 sps:$4 sm:$0xff]   ;;  %v2701_v28 = vld [vmem:[%s3932_s1 + $0xd0] ss:$8 sps:$4 sm:$0xff]   ;;  %v2702_v29 = vld [vmem:[%s3932_s1 + $0xe4] ss:$8 sps:$4 sm:$0xff]  }
   0xb   :  { %652 = vmatpush1.bf16.msra.mxu0 %v2668_v5  ;;  %v2704_v30 = vld [vmem:[%s3932_s1 + $0xe0] ss:$8 sps:$4 sm:$0xff]   ;;  %v2705_v31 = vld [vmem:[%s3932_s1 + $0xf4] ss:$8 sps:$4 sm:$0xff]   ;;  %v2707_v32 = vld [vmem:[%s3932_s1 + $0xf0] ss:$8 sps:$4 sm:$0xff]  }
   0xc   :  { %653 = vmatprep.subr.bf16.mxu0 %v2669_v6  ;;  %v2713_v33 = vld [vmem:[%s3932_s1 + $0x104] ss:$8 sps:$4 sm:$0xff]   ;;  %v2711_v35 = vld [vmem:[%s3932_s1 + $0x100] ss:$8 sps:$4 sm:$0xff]   ;;  %v2722_v37 = vld [vmem:[%s3932_s1 + $0x114] ss:$8 sps:$4 sm:$0xff]  }
   0xd   :  { %v2708_v34 = vld [vmem:[%s3933_s0] ss:$12 sps:$4 sm:$0xff]   ;;  %v2714_v36 = vld [vmem:[%s3933_s0 + $0x1c] ss:$12 sps:$4 sm:$0xff]   ;;  %v2720_v38 = vld [vmem:[%s3932_s1 + $0x110] ss:$8 sps:$4 sm:$0xff]  }
   0xe   :  { %v2731_v39 = vld [vmem:[%s3932_s1 + $0x124] ss:$8 sps:$4 sm:$0xff]   ;;  %v2717_v41 = vld [vmem:[%s3933_s0 + $0x34] ss:$12 sps:$4 sm:$0xff]   ;;  %v2738_v44 = vld [vmem:[%s3932_s1 + $0x130] ss:$8 sps:$4 sm:$0xff]  }
   0xf   :  { %654 = vmatpush1.bf16.msra.mxu0 %v2671_v7  ;;  %v2716_v40 = vld [vmem:[%s3933_s0 + $0x18] ss:$12 sps:$4 sm:$0xff]   ;;  %v2729_v42 = vld [vmem:[%s3932_s1 + $0x120] ss:$8 sps:$4 sm:$0xff]   ;;  %v2740_v43 = vld [vmem:[%s3932_s1 + $0x134] ss:$8 sps:$4 sm:$0xff]  }
  0x10   :  { %655 = vmatprep.subr.bf16.mxu0 %v2672_v8  ;;  %v2749_v45 = vld [vmem:[%s3932_s1 + $0x144] ss:$8 sps:$4 sm:$0xff]   ;;  %v2719_v46 = vld [vmem:[%s3933_s0 + $0x30] ss:$12 sps:$4 sm:$0xff]   ;;  %v2747_v48 = vld [vmem:[%s3932_s1 + $0x140] ss:$8 sps:$4 sm:$0xff]  }
  0x11   :  { %v2723_v47 = vld [vmem:[%s3933_s0 + $0x4c] ss:$12 sps:$4 sm:$0xff]   ;;  %v2758_v49 = vld [vmem:[%s3932_s1 + $0x154] ss:$8 sps:$4 sm:$0xff]   ;;  %v2726_v53 = vld [vmem:[%s3933_s0 + $0x64] ss:$12 sps:$4 sm:$0xff]  }
  0x12   :  { %v2756_v50 = vld [vmem:[%s3932_s1 + $0x150] ss:$8 sps:$4 sm:$0xff]   ;;  %v2767_v51 = vld [vmem:[%s3932_s1 + $0x164] ss:$8 sps:$4 sm:$0xff]   ;;  %v2725_v52 = vld [vmem:[%s3933_s0 + $0x48] ss:$12 sps:$4 sm:$0xff]  }
  0x13   :  { %656 = vmatpush1.bf16.msra.mxu0 %v2674_v9  ;;  %v2765_v54 = vld [vmem:[%s3932_s1 + $0x160] ss:$8 sps:$4 sm:$0xff]   ;;  %v2776_v55 = vld [vmem:[%s3932_s1 + $0x174] ss:$8 sps:$4 sm:$0xff]   ;;  %v2774_v56 = vld [vmem:[%s3932_s1 + $0x170] ss:$8 sps:$4 sm:$0xff]  }
  0x14   :  { %657 = vmatprep.subr.bf16.mxu0 %v2675_v10  ;;  %v2728_v57 = vld [vmem:[%s3933_s0 + $0x60] ss:$12 sps:$4 sm:$0xff]   ;;  %v2732_v58 = vld [vmem:[%s3933_s0 + $0x7c] ss:$12 sps:$4 sm:$0xff]   ;;  %v2734_v59 = vld [vmem:[%s3933_s0 + $0x78] ss:$12 sps:$4 sm:$0xff]  }
  0x15   :  { %v2735_v60 = vld [vmem:[%s3933_s0 + $0x94] ss:$12 sps:$4 sm:$0xff]   ;;  %v2737_v61 = vld [vmem:[%s3933_s0 + $0x90] ss:$12 sps:$4 sm:$0xff]   ;;  %v2741_v62 = vld [vmem:[%s3933_s0 + $0xac] ss:$12 sps:$4 sm:$0xff]  }
  0x16   :  { %v2743_v63 = vld [vmem:[%s3933_s0 + $0xa8] ss:$12 sps:$4 sm:$0xff]   ;;  %v2744_v0 = vld [vmem:[%s3933_s0 + $0xc4] ss:$12 sps:$4 sm:$0xff]   ;;  %v2746_v1 = vld [vmem:[%s3933_s0 + $0xc0] ss:$12 sps:$4 sm:$0xff]  }
  0x17   :  { %658 = vmatpush1.bf16.msra.mxu0 %v2677_v11  ;;  %v2750_v2 = vld [vmem:[%s3933_s0 + $0xdc] ss:$12 sps:$4 sm:$0xff]   ;;  %v2752_v3 = vld [vmem:[%s3933_s0 + $0xd8] ss:$12 sps:$4 sm:$0xff]   ;;  %v2753_v4 = vld [vmem:[%s3933_s0 + $0xf4] ss:$12 sps:$4 sm:$0xff]  }
  0x18   :  { %659 = vmatprep.subr.bf16.mxu0 %v2678_v12  ;;  %v2755_v5 = vld [vmem:[%s3933_s0 + $0xf0] ss:$12 sps:$4 sm:$0xff]   ;;  %v2759_v6 = vld [vmem:[%s3933_s0 + $0x10c] ss:$12 sps:$4 sm:$0xff]   ;;  %v2761_v7 = vld [vmem:[%s3933_s0 + $0x108] ss:$12 sps:$4 sm:$0xff]  }
  0x19   :  { %v2762_v8 = vld [vmem:[%s3933_s0 + $0x124] ss:$12 sps:$4 sm:$0xff]   ;;  %v2764_v9 = vld [vmem:[%s3933_s0 + $0x120] ss:$12 sps:$4 sm:$0xff]   ;;  %v2768_v10 = vld [vmem:[%s3933_s0 + $0x13c] ss:$12 sps:$4 sm:$0xff]  }
  0x1a   :  { %v2770_v11 = vld [vmem:[%s3933_s0 + $0x138] ss:$12 sps:$4 sm:$0xff]   ;;  %v2771_v12 = vld [vmem:[%s3933_s0 + $0x154] ss:$12 sps:$4 sm:$0xff]   ;;  %v2773_v13 = vld [vmem:[%s3933_s0 + $0x150] ss:$12 sps:$4 sm:$0xff]  }
  0x1b   :  { %660 = vmatpush1.bf16.msra.mxu0 %v2680_v14  ;;  %v2777_v14 = vld [vmem:[%s3933_s0 + $0x16c] ss:$12 sps:$4 sm:$0xff]  }
  0x1c   :  { %661 = vmatprep.subr.bf16.mxu0 %v2681_v15  ;;  %v2779_v15 = vld [vmem:[%s3933_s0 + $0x168] ss:$12 sps:$4 sm:$0xff]  }
  0x1f   :  { %662 = vmatpush1.bf16.msra.mxu0 %v2683_v16  ;;  %v3092_v16 = vmov 0  }
  0x20   :  { %663 = vmatprep.subr.bf16.mxu0 %v2684_v17  ;;  %v2796_v17 = vld [vmem:[%s3934_s3 + $0x40] sm:$0xff]  }
  0x21   :  { %2419 = vmatprep.subr.bf16.mxu1 %v2796_v17 }
  0x23   :  { %664 = vmatpush1.bf16.msra.mxu0 %v2686_v18  ;;  %v2780_v18 = vld [vmem:[%s3933_s0 + $0x8] ss:$12 sps:$4 sm:$0xff]  }
  0x24   :  { %665 = vmatprep.subr.bf16.mxu0 %v2687_v19  ;;  %v2797_v19 = vld [vmem:[%s3934_s3] sm:$0xff]  }
  0x25   :  { %2420 = vmatpush3.bf16.msra.mxu1 %v2797_v19 }
  0x27   :  { %666 = vmatpush1.bf16.msra.mxu0 %v2689_v20  ;;  %v2798_v20 = vld [vmem:[%s3934_s3 + $0x48] sm:$0xff]  }
  0x28   :  { %667 = vmatprep.subr.bf16.mxu0 %v2690_v21  ;;  %v2799_v21 = vld [vmem:[%s3934_s3 + $0x8] sm:$0xff]   ;;  %2421 = vmatprep.subr.bf16.mxu1 %v2798_v20 }
  0x29   :  { %2422 = vmatpush3.bf16.msra.mxu1 %v2799_v21  ;;  %v2820_v21 = vld [vmem:[%s3935_s5 + $0x24] ss:$8 sps:$4 sm:$0xff]  }
  0x2b   :  { %668 = vmatpush1.bf16.msra.mxu0 %v2692_v22  ;;  %v2800_v22 = vld [vmem:[%s3934_s3 + $0x50] sm:$0xff]  }
  0x2c   :  { %669 = vmatprep.subr.bf16.mxu0 %v2693_v23  ;;  %v2801_v23 = vld [vmem:[%s3934_s3 + $0x10] sm:$0xff]   ;;  %2423 = vmatprep.subr.bf16.mxu1 %v2800_v22 }
  0x2d   :  { %2424 = vmatpush3.bf16.msra.mxu1 %v2801_v23 }
  0x2f   :  { %670 = vmatpush1.bf16.msra.mxu0 %v2695_v24  ;;  %v2802_v24 = vld [vmem:[%s3934_s3 + $0x58] sm:$0xff]  }
  0x30   :  { %671 = vmatprep.subr.bf16.mxu0 %v2696_v25  ;;  %v2781_v25 = vld [vmem:[%s3933_s0 + $0x20] ss:$12 sps:$4 sm:$0xff]   ;;  %2425 = vmatprep.subr.bf16.mxu1 %v2802_v24 }
  0x33   :  { %672 = vmatpush1.bf16.msra.mxu0 %v2698_v26  ;;  %v2803_v26 = vld [vmem:[%s3934_s3 + $0x18] sm:$0xff]  }
  0x34   :  { %673 = vmatprep.subr.bf16.mxu0 %v2699_v27  ;;  %v2804_v27 = vld [vmem:[%s3934_s3 + $0x60] sm:$0xff]   ;;  %2426 = vmatpush3.bf16.msra.mxu1 %v2803_v26 }
  0x35   :  { %2427 = vmatprep.subr.bf16.mxu1 %v2804_v27  ;;  %v2818_v27 = vld [vmem:[%s3935_s5 + $0x20] ss:$8 sps:$4 sm:$0xff]  }
  0x37   :  { %674 = vmatpush1.bf16.msra.mxu0 %v2701_v28  ;;  %v2805_v28 = vld [vmem:[%s3934_s3 + $0x20] sm:$0xff]  }
  0x38   :  { %675 = vmatprep.subr.bf16.mxu0 %v2702_v29  ;;  %v2806_v29 = vld [vmem:[%s3934_s3 + $0x68] sm:$0xff]   ;;  %2428 = vmatpush3.bf16.msra.mxu1 %v2805_v28 }
  0x39   :  { %2429 = vmatprep.subr.bf16.mxu1 %v2806_v29 }
  0x3b   :  { %676 = vmatpush1.bf16.msra.mxu0 %v2704_v30  ;;  %v2782_v30 = vld [vmem:[%s3933_s0 + $0x38] ss:$12 sps:$4 sm:$0xff]  }
  0x3c   :  { %677 = vmatprep.subr.bf16.mxu0 %v2705_v31  ;;  %v2783_v31 = vld [vmem:[%s3933_s0 + $0x50] ss:$12 sps:$4 sm:$0xff]  }
  0x3f   :  { %678 = vmatpush1.bf16.msra.mxu0 %v2707_v32  ;;  %v2784_v32 = vld [vmem:[%s3933_s0 + $0x68] ss:$12 sps:$4 sm:$0xff]  }
  0x40   :  { %840 = vmatprep.subr.bf16.mxu0 %v2713_v33  ;;  %v2785_v33 = vld [vmem:[%s3933_s0 + $0x80] ss:$12 sps:$4 sm:$0xff]  }
  0x42   :  { %680 = vmatmul.mubr.bf16.vlgmr.msra.gmra.mrb[0].mxu0 %v2708_v34  ;;  %v2786_v34 = vld [vmem:[%s3933_s0 + $0x98] ss:$12 sps:$4 sm:$0xff]  }
  0x43   :  { %841 = vmatpush1.bf16.msra.mxu0 %v2711_v35  ;;  %689 = vmatprep.mubr.bf16.mxu0 %v2714_v36  ;;  %v2787_v35 = vld [vmem:[%s3933_s0 + $0xb0] ss:$12 sps:$4 sm:$0xff]   ;;  %v2788_v36 = vld [vmem:[%s3933_s0 + $0xc8] ss:$12 sps:$4 sm:$0xff]  }
  0x44   :  { %842 = vmatprep.subr.bf16.mxu0 %v2722_v37  ;;  %v2789_v37 = vld [vmem:[%s3933_s0 + $0xe0] ss:$12 sps:$4 sm:$0xff]  }
  0x47   :  { %843 = vmatpush1.bf16.msra.mxu0 %v2720_v38  ;;  %v2790_v38 = vld [vmem:[%s3933_s0 + $0xf8] ss:$12 sps:$4 sm:$0xff]  }
  0x48   :  { %844 = vmatprep.subr.bf16.mxu0 %v2731_v39  ;;  %v2807_v39 = vld [vmem:[%s3934_s3 + $0x28] sm:$0xff]  }
  0x49   :  { %2430 = vmatpush3.bf16.msra.mxu1 %v2807_v39  ;;  %v2826_v39 = vld [vmem:[%s3935_s5 + $0x44] ss:$8 sps:$4 sm:$0xff]  }
  0x4a   :  { %690 = vmatmul.mubr.bf16.gmra.mrb[4].mxu0 %v2716_v40  ;;  %v2791_v40 = vld [vmem:[%s3933_s0 + $0x110] ss:$12 sps:$4 sm:$0xff]  }
  0x4b   :  { %699 = vmatprep.mubr.bf16.mxu0 %v2717_v41  ;;  %845 = vmatpush1.bf16.msra.mxu0 %v2729_v42  ;;  %v2808_v41 = vld [vmem:[%s3934_s3 + $0x70] sm:$0xff]  }
  0x4c   :  { %846 = vmatprep.subr.bf16.mxu0 %v2740_v43  ;;  %v2809_v42 = vld [vmem:[%s3934_s3 + $0x30] sm:$0xff]   ;;  %2431 = vmatprep.subr.bf16.mxu1 %v2808_v41  ;;  %v2810_v43 = vld [vmem:[%s3934_s3 + $0x78] sm:$0xff]  }
  0x4d   :  { %2432 = vmatpush3.bf16.msra.mxu1 %v2809_v42 }
  0x4e   :  { %2433 = vmatprep.subr.bf16.mxu1 %v2810_v43 }
  0x4f   :  { %847 = vmatpush1.bf16.msra.mxu0 %v2738_v44  ;;  %v2811_v44 = vld [vmem:[%s3934_s3 + $0x38] sm:$0xff]  }
  0x50   :  { %848 = vmatprep.subr.bf16.mxu0 %v2749_v45  ;;  %v2792_v45 = vld [vmem:[%s3933_s0 + $0x128] ss:$12 sps:$4 sm:$0xff]  }
  0x51   :  { %2434 = vmatpush3.bf16.msra.mxu1 %v2811_v44 }
  0x52   :  { %700 = vmatmul.mubr.bf16.gmra.mrb[8].mxu0 %v2719_v46  ;;  %v2793_v46 = vld [vmem:[%s3933_s0 + $0x140] ss:$12 sps:$4 sm:$0xff]  }
  0x53   :  { %709 = vmatprep.mubr.bf16.mxu0 %v2723_v47  ;;  %849 = vmatpush1.bf16.msra.mxu0 %v2747_v48  ;;  %v2794_v47 = vld [vmem:[%s3933_s0 + $0x158] ss:$12 sps:$4 sm:$0xff]   ;;  %v2795_v48 = vld [vmem:[%s3933_s0 + $0x170] ss:$12 sps:$4 sm:$0xff]  }
  0x54   :  { %850 = vmatprep.subr.bf16.mxu0 %v2758_v49  ;;  %v141_v49 = vlaneseq }
  0x57   :  { %851 = vmatpush1.bf16.msra.mxu0 %v2756_v50  ;;  %v2814_v50 = vld [vmem:[%s3935_s5 + $0x4] ss:$8 sps:$4 sm:$0xff]  }
  0x58   :  { %852 = vmatprep.subr.bf16.mxu0 %v2767_v51  ;;  %1581 = vmatprep.subr.bf16.mxu1 %v2814_v50  ;;  %v3488_v51 = vshrl.u32 %v141_v49, 7 }
  0x5a   :  { %710 = vmatmul.mubr.bf16.gmra.mrb[12].mxu0 %v2725_v52  ;;  %v143_v52 = vsub.s32 0, %v3488_v51 }
  0x5b   :  { %719 = vmatprep.mubr.bf16.mxu0 %v2726_v53  ;;  %853 = vmatpush1.bf16.msra.mxu0 %v2765_v54  ;;  %v139_v53 = vld [vmem:[%s3936_s2] sm:$0x3]  ;;  %v147_v54 = vsub.s32 1, %v3488_v51 }
  0x5c   :  { %854 = vmatprep.subr.bf16.mxu0 %v2776_v55  ;;  %v3497_v55 = vrot.slane %v139_v53, %v143_v52 }
  0x5f   :  { %855 = vmatpush1.bf16.msra.mxu0 %v2774_v56  ;;  %v3501_v56 = vrot.slane %v139_v53, %v147_v54 }
  0x62   :  { %720 = vmatmul.mubr.bf16.gmra.mrb[16].mxu0 %v2728_v57 }
  0x63   :  { %729 = vmatprep.mubr.bf16.mxu0 %v2732_v58 }
  0x6a   :  { %730 = vmatmul.mubr.bf16.gmra.mrb[20].mxu0 %v2734_v59 }
  0x6b   :  { %739 = vmatprep.mubr.bf16.mxu0 %v2735_v60 }
  0x72   :  { %740 = vmatmul.mubr.bf16.gmra.mrb[24].mxu0 %v2737_v61 }
  0x73   :  { %749 = vmatprep.mubr.bf16.mxu0 %v2741_v62 }
  0x7a   :  { %750 = vmatmul.mubr.bf16.gmra.mrb[28].mxu0 %v2743_v63 }
  0x7b   :  { %759 = vmatprep.mubr.bf16.mxu0 %v2744_v0 }
  0x82   :  { %760 = vmatmul.mubr.bf16.gmra.mrb[32].mxu0 %v2746_v1 }
  0x83   :  { %769 = vmatprep.mubr.bf16.mxu0 %v2750_v2 }
  0x8a   :  { %770 = vmatmul.mubr.bf16.gmra.mrb[36].mxu0 %v2752_v3 }
  0x8b   :  { %779 = vmatprep.mubr.bf16.mxu0 %v2753_v4 }
  0x92   :  { %780 = vmatmul.mubr.bf16.gmra.mrb[40].mxu0 %v2755_v5 }
  0x93   :  { %789 = vmatprep.mubr.bf16.mxu0 %v2759_v6 }
  0x9a   :  { %790 = vmatmul.mubr.bf16.gmra.mrb[44].mxu0 %v2761_v7 }
  0x9b   :  { %799 = vmatprep.mubr.bf16.mxu0 %v2762_v8  ;;  %v2812_v8 = vld [vmem:[%s3935_s5] ss:$8 sps:$4 sm:$0xff]  }
  0xa2   :  { %800 = vmatmul.mubr.bf16.gmra.mrb[48].mxu0 %v2764_v9 }
  0xa3   :  { %809 = vmatprep.mubr.bf16.mxu0 %v2768_v10 }
  0xaa   :  { %810 = vmatmul.mubr.bf16.gmra.mrb[52].mxu0 %v2770_v11  ;;  %v2817_v11 = vld [vmem:[%s3935_s5 + $0x14] ss:$8 sps:$4 sm:$0xff]  }
  0xab   :  { %819 = vmatprep.mubr.bf16.mxu0 %v2771_v12 }
  0xb2   :  { %820 = vmatmul.mubr.bf16.gmra.mrb[56].mxu0 %v2773_v13 }
  0xb3   :  { %829 = vmatprep.mubr.bf16.mxu0 %v2777_v14 }
  0xba   :  { %830 = vmatmul.mubr.bf16.gmra.mrb[60].mxu0 %v2779_v15 }
  0xbb   :  { %872 = vmatprep.mubr.bf16.mxu0 %v3092_v16 }
  0xc2   :  { %873 = vmatmul.mubr.bf16.vlgmr.msra.gmra.mrb[0].mxu0 %v2780_v18  ;;  %v2815_v18 = vld [vmem:[%s3935_s5 + $0x10] ss:$8 sps:$4 sm:$0xff]  }
  0xc3   :  { %882 = vmatprep.mubr.bf16.mxu0 %v3092_v16 }
  0xca   :  { %883 = vmatmul.mubr.bf16.gmra.mrb[4].mxu0 %v2781_v25 }
  0xcb   :  { %892 = vmatprep.mubr.bf16.mxu0 %v3092_v16 }
  0xd2   :  { %893 = vmatmul.mubr.bf16.gmra.mrb[8].mxu0 %v2782_v30  ;;  %v2823_v30 = vld [vmem:[%s3935_s5 + $0x34] ss:$8 sps:$4 sm:$0xff]  }
  0xd3   :  { %902 = vmatprep.mubr.bf16.mxu0 %v3092_v16 }
  0xda   :  { %903 = vmatmul.mubr.bf16.gmra.mrb[12].mxu0 %v2783_v31 }
  0xdb   :  { %912 = vmatprep.mubr.bf16.mxu0 %v3092_v16 }
  0xe2   :  { %913 = vmatmul.mubr.bf16.gmra.mrb[16].mxu0 %v2784_v32 }
  0xe3   :  { %922 = vmatprep.mubr.bf16.mxu0 %v3092_v16 }
  0xea   :  { %923 = vmatmul.mubr.bf16.gmra.mrb[20].mxu0 %v2785_v33 }
  0xeb   :  { %932 = vmatprep.mubr.bf16.mxu0 %v3092_v16 }
  0xf2   :  { %933 = vmatmul.mubr.bf16.gmra.mrb[24].mxu0 %v2786_v34 }
  0xf3   :  { %942 = vmatprep.mubr.bf16.mxu0 %v3092_v16 }
  0xfa   :  { %943 = vmatmul.mubr.bf16.gmra.mrb[28].mxu0 %v2787_v35 }
  0xfb   :  { %952 = vmatprep.mubr.bf16.mxu0 %v3092_v16 }
 0x102   :  { %953 = vmatmul.mubr.bf16.gmra.mrb[32].mxu0 %v2788_v36  ;;  %v2821_v36 = vld [vmem:[%s3935_s5 + $0x30] ss:$8 sps:$4 sm:$0xff]  }
 0x103   :  { %962 = vmatprep.mubr.bf16.mxu0 %v3092_v16 }
 0x10a   :  { %963 = vmatmul.mubr.bf16.gmra.mrb[36].mxu0 %v2789_v37 }
 0x10b   :  { %972 = vmatprep.mubr.bf16.mxu0 %v3092_v16 }
 0x112   :  { %973 = vmatmul.mubr.bf16.gmra.mrb[40].mxu0 %v2790_v38 }
 0x113   :  { %982 = vmatprep.mubr.bf16.mxu0 %v3092_v16 }
 0x11a   :  { %983 = vmatmul.mubr.bf16.gmra.mrb[44].mxu0 %v2791_v40 }
 0x11b   :  { %992 = vmatprep.mubr.bf16.mxu0 %v3092_v16 }
 0x122   :  { %993 = vmatmul.mubr.bf16.gmra.mrb[48].mxu0 %v2792_v45  ;;  %v2824_v45 = vld [vmem:[%s3935_s5 + $0x40] ss:$8 sps:$4 sm:$0xff]  }
 0x123   :  { %1002 = vmatprep.mubr.bf16.mxu0 %v3092_v16 }
 0x12a   :  { %1003 = vmatmul.mubr.bf16.gmra.mrb[52].mxu0 %v2793_v46 }
 0x12b   :  { %1012 = vmatprep.mubr.bf16.mxu0 %v3092_v16 }
 0x132   :  { %1013 = vmatmul.mubr.bf16.gmra.mrb[56].mxu0 %v2794_v47 }
 0x133   :  { %1022 = vmatprep.mubr.bf16.mxu0 %v3092_v16 }
 0x13a   :  { %1023 = vmatmul.mubr.bf16.gmra.mrb[60].mxu0 %v2795_v48  ;;  %v2829_v48 = vld [vmem:[%s3935_s5 + $0x54] ss:$8 sps:$4 sm:$0xff]  }
 0x195   :  { %v874_v57 = vpop.f32.mrb[0].mxu0 }
 0x196   :  { %v2531_v58 = vadd.f32 %v874_v57, %v3497_v55  ;;  %v876_v59 = vpop.f32.mrb[1].mxu0 }
 0x197   :  { %v2532_v60 = vadd.f32 %v876_v59, %v3501_v56  ;;  %v878_v61 = vpop.f32.mrb[2].mxu0  ;;  %v2827_v59 = vld [vmem:[%s3935_s5 + $0x50] ss:$8 sps:$4 sm:$0xff]  }
 0x198   :  { %v2533_v62 = vadd.f32 %v878_v61, %v3497_v55  ;;  %v880_v63 = vpop.f32.mrb[3].mxu0  ;;  %v1033_v1 = vmax.f32 %v2531_v58, 0.0 }
 0x199   :  { %v2534_v0 = vadd.f32 %v880_v63, %v3501_v56  ;;  %v1034_v3 = vmax.f32 %v2532_v60, 0.0 }
 0x19a   :  { %v1035_v2 = vmax.f32 %v2533_v62, 0.0  ;;  %v2832_v62 = vld [vmem:[%s3935_s5 + $0x64] ss:$8 sps:$4 sm:$0xff]  }
 0x19b   :  { %v1036_v4 = vmax.f32 %v2534_v0, 0.0 }
 0x19c   :  { %v1097_v5 = vpack.c.bf16 %v1035_v2, %v1033_v1 }
 0x19d   :  { %v884_v6 = vpop.f32.mrb[4].mxu0  ;;  %v1098_v7 = vpack.c.bf16 %v1036_v4, %v1034_v3  ;;  %v2830_v4 = vld [vmem:[%s3935_s5 + $0x60] ss:$8 sps:$4 sm:$0xff]  }
 0x19e   :  { %v2535_v9 = vadd.f32 %v884_v6, %v3497_v55  ;;  %v886_v10 = vpop.f32.mrb[5].mxu0 }
 0x19f   :  { %v2536_v12 = vadd.f32 %v886_v10, %v3501_v56  ;;  %v888_v13 = vpop.f32.mrb[6].mxu0  ;;  %1296 = vmatprep.mubr.bf16.mxu1 %v1098_v7  ;;  %v2835_v7 = vld [vmem:[%s3935_s5 + $0x74] ss:$8 sps:$4 sm:$0xff]  }
 0x1a0   :  { %v2537_v14 = vadd.f32 %v888_v13, %v3497_v55  ;;  %v890_v15 = vpop.f32.mrb[7].mxu0  ;;  %1297 = vmatmul.mubr.bf16.vlgmr.msra.gmra.mrb[0].mxu1 %v1097_v5  ;;  %v1037_v19 = vmax.f32 %v2535_v9, 0.0  ;;  %v2833_v13 = vld [vmem:[%s3935_s5 + $0x70] ss:$8 sps:$4 sm:$0xff]  }
 0x1a1   :  { %v2538_v17 = vadd.f32 %v890_v15, %v3501_v56  ;;  %1582 = vmatpush1.bf16.msra.mxu1 %v2812_v8  ;;  %v1038_v22 = vmax.f32 %v2536_v12, 0.0 }
 0x1a2   :  { %v1039_v20 = vmax.f32 %v2537_v14, 0.0  ;;  %1583 = vmatprep.subr.bf16.mxu1 %v2817_v11 }
 0x1a3   :  { %v1040_v23 = vmax.f32 %v2538_v17, 0.0 }
 0x1a4   :  { %v1099_v24 = vpack.c.bf16 %v1039_v20, %v1037_v19 }
 0x1a5   :  { %v1100_v25 = vpack.c.bf16 %v1040_v23, %v1038_v22  ;;  %v894_v26 = vpop.f32.mrb[8].mxu0  ;;  %1584 = vmatpush1.bf16.msra.mxu1 %v2815_v18 }
 0x1a6   :  { %v2539_v28 = vadd.f32 %v894_v26, %v3497_v55  ;;  %v896_v29 = vpop.f32.mrb[9].mxu0  ;;  %1585 = vmatprep.subr.bf16.mxu1 %v2820_v21 }
 0x1a7   :  { %v2540_v31 = vadd.f32 %v896_v29, %v3501_v56  ;;  %v898_v32 = vpop.f32.mrb[10].mxu0  ;;  %1304 = vmatprep.mubr.bf16.mxu1 %v1100_v25 }
 0x1a8   :  { %v2541_v33 = vadd.f32 %v898_v32, %v3497_v55  ;;  %v900_v34 = vpop.f32.mrb[11].mxu0  ;;  %1305 = vmatmul.mubr.bf16.gmra.mrb[4].mxu1 %v1099_v24  ;;  %v1041_v37 = vmax.f32 %v2539_v28, 0.0 }
 0x1a9   :  { %v2542_v35 = vadd.f32 %v900_v34, %v3501_v56  ;;  %1586 = vmatpush1.bf16.msra.mxu1 %v2818_v27  ;;  %v1042_v40 = vmax.f32 %v2540_v31, 0.0 }
 0x1aa   :  { %v1043_v38 = vmax.f32 %v2541_v33, 0.0  ;;  %1587 = vmatprep.subr.bf16.mxu1 %v2823_v30 }
 0x1ab   :  { %v1044_v41 = vmax.f32 %v2542_v35, 0.0 }
 0x1ac   :  { %v1101_v42 = vpack.c.bf16 %v1043_v38, %v1041_v37 }
 0x1ad   :  { %v1102_v43 = vpack.c.bf16 %v1044_v41, %v1042_v40  ;;  %v904_v44 = vpop.f32.mrb[12].mxu0  ;;  %1588 = vmatpush1.bf16.msra.mxu1 %v2821_v36 }
 0x1ae   :  { %v2543_v46 = vadd.f32 %v904_v44, %v3497_v55  ;;  %v906_v47 = vpop.f32.mrb[13].mxu0  ;;  %1589 = vmatprep.subr.bf16.mxu1 %v2826_v39 }
 0x1af   :  { %v2544_v49 = vadd.f32 %v906_v47, %v3501_v56  ;;  %v908_v50 = vpop.f32.mrb[14].mxu0  ;;  %1312 = vmatprep.mubr.bf16.mxu1 %v1102_v43 }
 0x1b0   :  { %v2545_v53 = vadd.f32 %v908_v50, %v3497_v55  ;;  %v910_v57 = vpop.f32.mrb[15].mxu0  ;;  %1313 = vmatmul.mubr.bf16.gmra.mrb[8].mxu1 %v1101_v42  ;;  %v1045_v60 = vmax.f32 %v2543_v46, 0.0 }
 0x1b1   :  { %v2546_v58 = vadd.f32 %v910_v57, %v3501_v56  ;;  %1590 = vmatpush1.bf16.msra.mxu1 %v2824_v45  ;;  %v1046_v63 = vmax.f32 %v2544_v49, 0.0 }
 0x1b2   :  { %v1047_v61 = vmax.f32 %v2545_v53, 0.0  ;;  %1591 = vmatprep.subr.bf16.mxu1 %v2829_v48 }
 0x1b3   :  { %v1048_v0 = vmax.f32 %v2546_v58, 0.0 }
 0x1b4   :  { %v1103_v1 = vpack.c.bf16 %v1047_v61, %v1045_v60 }
 0x1b5   :  { %v1104_v2 = vpack.c.bf16 %v1048_v0, %v1046_v63  ;;  %v914_v3 = vpop.f32.mrb[16].mxu0  ;;  %1592 = vmatpush1.bf16.msra.mxu1 %v2827_v59 }
 0x1b6   :  { %v2547_v5 = vadd.f32 %v914_v3, %v3497_v55  ;;  %v916_v6 = vpop.f32.mrb[17].mxu0  ;;  %1593 = vmatprep.subr.bf16.mxu1 %v2832_v62 }
 0x1b7   :  { %v2548_v8 = vadd.f32 %v916_v6, %v3501_v56  ;;  %v918_v9 = vpop.f32.mrb[18].mxu0  ;;  %1320 = vmatprep.mubr.bf16.mxu1 %v1104_v2 }
 0x1b8   :  { %v2549_v10 = vadd.f32 %v918_v9, %v3497_v55  ;;  %v920_v11 = vpop.f32.mrb[19].mxu0  ;;  %1321 = vmatmul.mubr.bf16.gmra.mrb[12].mxu1 %v1103_v1  ;;  %v1049_v14 = vmax.f32 %v2547_v5, 0.0 }
 0x1b9   :  { %v2550_v12 = vadd.f32 %v920_v11, %v3501_v56  ;;  %1594 = vmatpush1.bf16.msra.mxu1 %v2830_v4  ;;  %v1050_v17 = vmax.f32 %v2548_v8, 0.0 }
 0x1ba   :  { %v1051_v15 = vmax.f32 %v2549_v10, 0.0  ;;  %1595 = vmatprep.subr.bf16.mxu1 %v2835_v7 }
 0x1bb   :  { %v1052_v18 = vmax.f32 %v2550_v12, 0.0 }
 0x1bc   :  { %v1105_v19 = vpack.c.bf16 %v1051_v15, %v1049_v14 }
 0x1bd   :  { %v1106_v20 = vpack.c.bf16 %v1052_v18, %v1050_v17  ;;  %v924_v21 = vpop.f32.mrb[20].mxu0  ;;  %1596 = vmatpush1.bf16.msra.mxu1 %v2833_v13 }
 0x1be   :  { %v2551_v22 = vadd.f32 %v924_v21, %v3497_v55  ;;  %v926_v23 = vpop.f32.mrb[21].mxu0 }
 0x1bf   :  { %v2552_v24 = vadd.f32 %v926_v23, %v3501_v56  ;;  %v928_v25 = vpop.f32.mrb[22].mxu0  ;;  %1328 = vmatprep.mubr.bf16.mxu1 %v1106_v20 }
 0x1c0   :  { %v2553_v26 = vadd.f32 %v928_v25, %v3497_v55  ;;  %v930_v27 = vpop.f32.mrb[23].mxu0  ;;  %1329 = vmatmul.mubr.bf16.gmra.mrb[16].mxu1 %v1105_v19  ;;  %v1053_v29 = vmax.f32 %v2551_v22, 0.0 }
 0x1c1   :  { %v2554_v28 = vadd.f32 %v930_v27, %v3501_v56  ;;  %v1054_v31 = vmax.f32 %v2552_v24, 0.0 }
 0x1c2   :  { %v1055_v30 = vmax.f32 %v2553_v26, 0.0 }
 0x1c3   :  { %v1056_v32 = vmax.f32 %v2554_v28, 0.0 }
 0x1c4   :  { %v1107_v33 = vpack.c.bf16 %v1055_v30, %v1053_v29 }
 0x1c5   :  { %v1108_v34 = vpack.c.bf16 %v1056_v32, %v1054_v31  ;;  %v934_v35 = vpop.f32.mrb[24].mxu0 }
 0x1c6   :  { %v2555_v36 = vadd.f32 %v934_v35, %v3497_v55  ;;  %v936_v37 = vpop.f32.mrb[25].mxu0 }
 0x1c7   :  { %v2556_v38 = vadd.f32 %v936_v37, %v3501_v56  ;;  %v938_v39 = vpop.f32.mrb[26].mxu0  ;;  %1336 = vmatprep.mubr.bf16.mxu1 %v1108_v34 }
 0x1c8   :  { %v2557_v40 = vadd.f32 %v938_v39, %v3497_v55  ;;  %v940_v41 = vpop.f32.mrb[27].mxu0  ;;  %1337 = vmatmul.mubr.bf16.gmra.mrb[20].mxu1 %v1107_v33  ;;  %v1057_v43 = vmax.f32 %v2555_v36, 0.0 }
 0x1c9   :  { %v2558_v42 = vadd.f32 %v940_v41, %v3501_v56  ;;  %v1058_v45 = vmax.f32 %v2556_v38, 0.0 }
 0x1ca   :  { %v1059_v44 = vmax.f32 %v2557_v40, 0.0 }
 0x1cb   :  { %v1060_v46 = vmax.f32 %v2558_v42, 0.0 }
 0x1cc   :  { %v1109_v47 = vpack.c.bf16 %v1059_v44, %v1057_v43 }
 0x1cd   :  { %v1110_v48 = vpack.c.bf16 %v1060_v46, %v1058_v45  ;;  %v944_v49 = vpop.f32.mrb[28].mxu0 }
 0x1ce   :  { %v2559_v50 = vadd.f32 %v944_v49, %v3497_v55  ;;  %v946_v53 = vpop.f32.mrb[29].mxu0 }
 0x1cf   :  { %v2560_v57 = vadd.f32 %v946_v53, %v3501_v56  ;;  %v948_v58 = vpop.f32.mrb[30].mxu0  ;;  %1344 = vmatprep.mubr.bf16.mxu1 %v1110_v48 }
 0x1d0   :  { %v2561_v59 = vadd.f32 %v948_v58, %v3497_v55  ;;  %v950_v60 = vpop.f32.mrb[31].mxu0  ;;  %1345 = vmatmul.mubr.bf16.gmra.mrb[24].mxu1 %v1109_v47  ;;  %v1061_v62 = vmax.f32 %v2559_v50, 0.0 }
 0x1d1   :  { %v2562_v61 = vadd.f32 %v950_v60, %v3501_v56  ;;  %v1062_v0 = vmax.f32 %v2560_v57, 0.0 }
 0x1d2   :  { %v1063_v63 = vmax.f32 %v2561_v59, 0.0 }
 0x1d3   :  { %v1064_v1 = vmax.f32 %v2562_v61, 0.0 }
 0x1d4   :  { %v1111_v2 = vpack.c.bf16 %v1063_v63, %v1061_v62 }
 0x1d5   :  { %v1112_v3 = vpack.c.bf16 %v1064_v1, %v1062_v0  ;;  %v954_v4 = vpop.f32.mrb[32].mxu0 }
 0x1d6   :  { %v2563_v5 = vadd.f32 %v954_v4, %v3497_v55  ;;  %v956_v6 = vpop.f32.mrb[33].mxu0 }
 0x1d7   :  { %v2564_v7 = vadd.f32 %v956_v6, %v3501_v56  ;;  %v958_v8 = vpop.f32.mrb[34].mxu0  ;;  %1352 = vmatprep.mubr.bf16.mxu1 %v1112_v3 }
 0x1d8   :  { %v2565_v9 = vadd.f32 %v958_v8, %v3497_v55  ;;  %v960_v10 = vpop.f32.mrb[35].mxu0  ;;  %1353 = vmatmul.mubr.bf16.gmra.mrb[28].mxu1 %v1111_v2  ;;  %v1065_v12 = vmax.f32 %v2563_v5, 0.0 }
 0x1d9   :  { %v2566_v11 = vadd.f32 %v960_v10, %v3501_v56  ;;  %v1066_v14 = vmax.f32 %v2564_v7, 0.0 }
 0x1da   :  { %v1067_v13 = vmax.f32 %v2565_v9, 0.0 }
 0x1db   :  { %v1068_v15 = vmax.f32 %v2566_v11, 0.0 }
 0x1dc   :  { %v1113_v17 = vpack.c.bf16 %v1067_v13, %v1065_v12 }
 0x1dd   :  { %v1114_v18 = vpack.c.bf16 %v1068_v15, %v1066_v14  ;;  %v964_v19 = vpop.f32.mrb[36].mxu0 }
 0x1de   :  { %v2567_v20 = vadd.f32 %v964_v19, %v3497_v55  ;;  %v966_v21 = vpop.f32.mrb[37].mxu0 }
 0x1df   :  { %v2568_v22 = vadd.f32 %v966_v21, %v3501_v56  ;;  %v968_v23 = vpop.f32.mrb[38].mxu0  ;;  %1360 = vmatprep.mubr.bf16.mxu1 %v1114_v18 }
 0x1e0   :  { %v2569_v24 = vadd.f32 %v968_v23, %v3497_v55  ;;  %v970_v25 = vpop.f32.mrb[39].mxu0  ;;  %1361 = vmatmul.mubr.bf16.gmra.mrb[32].mxu1 %v1113_v17  ;;  %v1069_v27 = vmax.f32 %v2567_v20, 0.0 }
 0x1e1   :  { %v2570_v26 = vadd.f32 %v970_v25, %v3501_v56  ;;  %v1070_v29 = vmax.f32 %v2568_v22, 0.0 }
 0x1e2   :  { %v1071_v28 = vmax.f32 %v2569_v24, 0.0 }
 0x1e3   :  { %v1072_v30 = vmax.f32 %v2570_v26, 0.0 }
 0x1e4   :  { %v1115_v31 = vpack.c.bf16 %v1071_v28, %v1069_v27 }
 0x1e5   :  { %v1116_v32 = vpack.c.bf16 %v1072_v30, %v1070_v29  ;;  %v974_v33 = vpop.f32.mrb[40].mxu0 }
 0x1e6   :  { %v2571_v34 = vadd.f32 %v974_v33, %v3497_v55  ;;  %v976_v35 = vpop.f32.mrb[41].mxu0 }
 0x1e7   :  { %v2572_v36 = vadd.f32 %v976_v35, %v3501_v56  ;;  %v978_v37 = vpop.f32.mrb[42].mxu0  ;;  %1368 = vmatprep.mubr.bf16.mxu1 %v1116_v32 }
 0x1e8   :  { %v2573_v38 = vadd.f32 %v978_v37, %v3497_v55  ;;  %v980_v39 = vpop.f32.mrb[43].mxu0  ;;  %1369 = vmatmul.mubr.bf16.gmra.mrb[36].mxu1 %v1115_v31  ;;  %v1073_v41 = vmax.f32 %v2571_v34, 0.0 }
 0x1e9   :  { %v2574_v40 = vadd.f32 %v980_v39, %v3501_v56  ;;  %v1074_v43 = vmax.f32 %v2572_v36, 0.0 }
 0x1ea   :  { %v1075_v42 = vmax.f32 %v2573_v38, 0.0 }
 0x1eb   :  { %v1076_v44 = vmax.f32 %v2574_v40, 0.0 }
 0x1ec   :  { %v1117_v45 = vpack.c.bf16 %v1075_v42, %v1073_v41 }
 0x1ed   :  { %v1118_v46 = vpack.c.bf16 %v1076_v44, %v1074_v43  ;;  %v984_v47 = vpop.f32.mrb[44].mxu0 }
 0x1ee   :  { %v2575_v48 = vadd.f32 %v984_v47, %v3497_v55  ;;  %v986_v49 = vpop.f32.mrb[45].mxu0 }
 0x1ef   :  { %v2576_v50 = vadd.f32 %v986_v49, %v3501_v56  ;;  %v988_v53 = vpop.f32.mrb[46].mxu0  ;;  %1376 = vmatprep.mubr.bf16.mxu1 %v1118_v46 }
 0x1f0   :  { %v2577_v57 = vadd.f32 %v988_v53, %v3497_v55  ;;  %v990_v58 = vpop.f32.mrb[47].mxu0  ;;  %1377 = vmatmul.mubr.bf16.gmra.mrb[40].mxu1 %v1117_v45  ;;  %v1077_v60 = vmax.f32 %v2575_v48, 0.0 }
 0x1f1   :  { %v2578_v59 = vadd.f32 %v990_v58, %v3501_v56  ;;  %v1078_v62 = vmax.f32 %v2576_v50, 0.0 }
 0x1f2   :  { %v1079_v61 = vmax.f32 %v2577_v57, 0.0 }
 0x1f3   :  { %v1080_v63 = vmax.f32 %v2578_v59, 0.0 }
 0x1f4   :  { %v1119_v0 = vpack.c.bf16 %v1079_v61, %v1077_v60 }
 0x1f5   :  { %v1120_v1 = vpack.c.bf16 %v1080_v63, %v1078_v62  ;;  %v994_v2 = vpop.f32.mrb[48].mxu0 }
 0x1f6   :  { %v2579_v3 = vadd.f32 %v994_v2, %v3497_v55  ;;  %v996_v4 = vpop.f32.mrb[49].mxu0 }
 0x1f7   :  { %v2580_v5 = vadd.f32 %v996_v4, %v3501_v56  ;;  %v998_v6 = vpop.f32.mrb[50].mxu0  ;;  %1384 = vmatprep.mubr.bf16.mxu1 %v1120_v1  ;;  %v3616_v1 = vld [vmem:[%s3937_s4] ss:$0 sm:$0xff] }
 0x1f8   :  { %v2581_v7 = vadd.f32 %v998_v6, %v3497_v55  ;;  %v1000_v8 = vpop.f32.mrb[51].mxu0  ;;  %1385 = vmatmul.mubr.bf16.gmra.mrb[44].mxu1 %v1119_v0  ;;  %v1081_v10 = vmax.f32 %v2579_v3, 0.0 }
 0x1f9   :  { %v2582_v9 = vadd.f32 %v1000_v8, %v3501_v56  ;;  %v1082_v12 = vmax.f32 %v2580_v5, 0.0 }
 0x1fa   :  { %v1083_v11 = vmax.f32 %v2581_v7, 0.0 }
 0x1fb   :  { %v1084_v13 = vmax.f32 %v2582_v9, 0.0 }
 0x1fc   :  { %v1121_v14 = vpack.c.bf16 %v1083_v11, %v1081_v10 }
 0x1fd   :  { %v1122_v15 = vpack.c.bf16 %v1084_v13, %v1082_v12  ;;  %v1004_v17 = vpop.f32.mrb[52].mxu0 }
 0x1fe   :  { %v2583_v18 = vadd.f32 %v1004_v17, %v3497_v55  ;;  %v1006_v19 = vpop.f32.mrb[53].mxu0 }
 0x1ff   :  { %v2584_v20 = vadd.f32 %v1006_v19, %v3501_v56  ;;  %v1008_v21 = vpop.f32.mrb[54].mxu0  ;;  %1392 = vmatprep.mubr.bf16.mxu1 %v1122_v15 }
 0x200   :  { %v2585_v22 = vadd.f32 %v1008_v21, %v3497_v55  ;;  %v1010_v23 = vpop.f32.mrb[55].mxu0  ;;  %1393 = vmatmul.mubr.bf16.gmra.mrb[48].mxu1 %v1121_v14  ;;  %v1085_v25 = vmax.f32 %v2583_v18, 0.0 }
 0x201   :  { %v2586_v24 = vadd.f32 %v1010_v23, %v3501_v56  ;;  %v1086_v27 = vmax.f32 %v2584_v20, 0.0 }
 0x202   :  { %v1087_v26 = vmax.f32 %v2585_v22, 0.0 }
 0x203   :  { %v1088_v28 = vmax.f32 %v2586_v24, 0.0 }
 0x204   :  { %v1123_v29 = vpack.c.bf16 %v1087_v26, %v1085_v25 }
 0x205   :  { %v1124_v30 = vpack.c.bf16 %v1088_v28, %v1086_v27  ;;  %v1014_v31 = vpop.f32.mrb[56].mxu0 }
 0x206   :  { %v2587_v32 = vadd.f32 %v1014_v31, %v3497_v55  ;;  %v1016_v33 = vpop.f32.mrb[57].mxu0 }
 0x207   :  { %v2588_v34 = vadd.f32 %v1016_v33, %v3501_v56  ;;  %v1018_v35 = vpop.f32.mrb[58].mxu0  ;;  %1400 = vmatprep.mubr.bf16.mxu1 %v1124_v30 }
 0x208   :  { %v2589_v36 = vadd.f32 %v1018_v35, %v3497_v55  ;;  %v1020_v37 = vpop.f32.mrb[59].mxu0  ;;  %1401 = vmatmul.mubr.bf16.gmra.mrb[52].mxu1 %v1123_v29  ;;  %v1089_v39 = vmax.f32 %v2587_v32, 0.0 }
 0x209   :  { %v2590_v38 = vadd.f32 %v1020_v37, %v3501_v56  ;;  %v1090_v41 = vmax.f32 %v2588_v34, 0.0 }
 0x20a   :  { %v1091_v40 = vmax.f32 %v2589_v36, 0.0 }
 0x20b   :  { %v1092_v42 = vmax.f32 %v2590_v38, 0.0 }
 0x20c   :  { %v1125_v43 = vpack.c.bf16 %v1091_v40, %v1089_v39 }
 0x20d   :  { %v1126_v44 = vpack.c.bf16 %v1092_v42, %v1090_v41  ;;  %v1024_v45 = vpop.f32.mrb[60].mxu0 }
 0x20e   :  { %v2591_v46 = vadd.f32 %v1024_v45, %v3497_v55  ;;  %v1026_v47 = vpop.f32.mrb[61].mxu0 }
 0x20f   :  { %v2592_v48 = vadd.f32 %v1026_v47, %v3501_v56  ;;  %v1028_v49 = vpop.f32.mrb[62].mxu0  ;;  %1408 = vmatprep.mubr.bf16.mxu1 %v1126_v44 }
 0x210   :  { %v2593_v50 = vadd.f32 %v1028_v49, %v3497_v55  ;;  %v1030_v53 = vpop.f32.mrb[63].mxu0  ;;  %1409 = vmatmul.mubr.bf16.gmra.mrb[56].mxu1 %v1125_v43  ;;  %v1093_v58 = vmax.f32 %v2591_v46, 0.0 }
 0x211   :  { %v2594_v57 = vadd.f32 %v1030_v53, %v3501_v56  ;;  %v1094_v60 = vmax.f32 %v2592_v48, 0.0 }
 0x212   :  { %v1095_v59 = vmax.f32 %v2593_v50, 0.0 }
 0x213   :  { %v1096_v61 = vmax.f32 %v2594_v57, 0.0 }
 0x214   :  { %v1127_v62 = vpack.c.bf16 %v1095_v59, %v1093_v58 }
 0x215   :  { %v1128_v63 = vpack.c.bf16 %v1096_v61, %v1094_v60 }
 0x217   :  { %1416 = vmatprep.mubr.bf16.mxu1 %v1128_v63 }
 0x218   :  { %1417 = vmatmul.mubr.bf16.gmra.mrb[60].mxu1 %v1127_v62 }
 0x219   :  { %1613 = vmatprep.mubr.bf16.mxu1 %v3092_v16 }
 0x273   :  { %v2435_v0 = vpop.f32.mrb[0].mxu1 }
 0x274   :  { %v2436_v55 = vpop.f32.mrb[1].mxu1 }
 0x275   :  { %v2437_v2 = vadd.f32 %v2436_v55, %v2435_v0  ;;  %v2438_v3 = vpop.f32.mrb[2].mxu1 }
 0x276   :  { %v2439_v56 = vpop.f32.mrb[3].mxu1 }
 0x277   :  { %v1299_v4 = vadd.f32 %v2437_v2, %v3616_v1  ;;  %v2440_v5 = vadd.f32 %v2439_v56, %v2438_v3 }
 0x279   :  { %v1302_v6 = vadd.f32 %v2440_v5, %v3616_v1  ;;  %v1425_v7 = vmax.f32 %v1299_v4, 0.0 }
 0x27b   :  { %v1426_v8 = vmax.f32 %v1302_v6, 0.0  ;;  %v2441_v9 = vpop.f32.mrb[4].mxu1 }
 0x27c   :  { %v2442_v10 = vpop.f32.mrb[5].mxu1 }
 0x27d   :  { %v1457_v11 = vpack.c.bf16 %v1426_v8, %v1425_v7  ;;  %v2443_v12 = vadd.f32 %v2442_v10, %v2441_v9  ;;  %v2444_v13 = vpop.f32.mrb[6].mxu1 }
 0x27e   :  { %v2445_v14 = vpop.f32.mrb[7].mxu1 }
 0x27f   :  { %v1307_v15 = vadd.f32 %v2443_v12, %v3616_v1  ;;  %v2446_v17 = vadd.f32 %v2445_v14, %v2444_v13  ;;  %1614 = vmatmul.mubr.bf16.vlgmr.msra.gmra.mrb[64].mxu1 %v1457_v11 }
 0x280   :  { %1623 = vmatprep.mubr.bf16.mxu1 %v3092_v16 }
 0x281   :  { %v1310_v18 = vadd.f32 %v2446_v17, %v3616_v1  ;;  %v1427_v19 = vmax.f32 %v1307_v15, 0.0 }
 0x283   :  { %v1428_v20 = vmax.f32 %v1310_v18, 0.0  ;;  %v2447_v21 = vpop.f32.mrb[8].mxu1 }
 0x284   :  { %v2448_v22 = vpop.f32.mrb[9].mxu1 }
 0x285   :  { %v2449_v23 = vadd.f32 %v2448_v22, %v2447_v21  ;;  %v2450_v24 = vpop.f32.mrb[10].mxu1  ;;  %v1458_v25 = vpack.c.bf16 %v1428_v20, %v1427_v19 }
 0x286   :  { %v2451_v26 = vpop.f32.mrb[11].mxu1 }
 0x287   :  { %v1315_v27 = vadd.f32 %v2449_v23, %v3616_v1  ;;  %v2452_v28 = vadd.f32 %v2451_v26, %v2450_v24  ;;  %1624 = vmatmul.mubr.bf16.gmra.mrb[68].mxu1 %v1458_v25 }
 0x288   :  { %1633 = vmatprep.mubr.bf16.mxu1 %v3092_v16 }
 0x289   :  { %v1318_v29 = vadd.f32 %v2452_v28, %v3616_v1  ;;  %v1429_v30 = vmax.f32 %v1315_v27, 0.0 }
 0x28b   :  { %v1430_v31 = vmax.f32 %v1318_v29, 0.0  ;;  %v2453_v32 = vpop.f32.mrb[12].mxu1 }
 0x28c   :  { %v2454_v33 = vpop.f32.mrb[13].mxu1 }
 0x28d   :  { %v2455_v34 = vadd.f32 %v2454_v33, %v2453_v32  ;;  %v2456_v35 = vpop.f32.mrb[14].mxu1  ;;  %v1459_v36 = vpack.c.bf16 %v1430_v31, %v1429_v30 }
 0x28e   :  { %v2457_v37 = vpop.f32.mrb[15].mxu1 }
 0x28f   :  { %v1323_v38 = vadd.f32 %v2455_v34, %v3616_v1  ;;  %v2458_v39 = vadd.f32 %v2457_v37, %v2456_v35  ;;  %1634 = vmatmul.mubr.bf16.gmra.mrb[72].mxu1 %v1459_v36 }
 0x290   :  { %1643 = vmatprep.mubr.bf16.mxu1 %v3092_v16 }
 0x291   :  { %v1326_v40 = vadd.f32 %v2458_v39, %v3616_v1  ;;  %v1431_v41 = vmax.f32 %v1323_v38, 0.0 }
 0x293   :  { %v1432_v42 = vmax.f32 %v1326_v40, 0.0  ;;  %v2459_v43 = vpop.f32.mrb[16].mxu1 }
 0x294   :  { %v2460_v44 = vpop.f32.mrb[17].mxu1 }
 0x295   :  { %v2461_v45 = vadd.f32 %v2460_v44, %v2459_v43  ;;  %v2462_v46 = vpop.f32.mrb[18].mxu1  ;;  %v1460_v47 = vpack.c.bf16 %v1432_v42, %v1431_v41 }
 0x296   :  { %v2463_v48 = vpop.f32.mrb[19].mxu1 }
 0x297   :  { %v1331_v49 = vadd.f32 %v2461_v45, %v3616_v1  ;;  %v2464_v50 = vadd.f32 %v2463_v48, %v2462_v46  ;;  %1644 = vmatmul.mubr.bf16.gmra.mrb[76].mxu1 %v1460_v47 }
 0x298   :  { %1653 = vmatprep.mubr.bf16.mxu1 %v3092_v16 }
 0x299   :  { %v1334_v53 = vadd.f32 %v2464_v50, %v3616_v1  ;;  %v1433_v57 = vmax.f32 %v1331_v49, 0.0 }
 0x29b   :  { %v1434_v58 = vmax.f32 %v1334_v53, 0.0  ;;  %v2465_v59 = vpop.f32.mrb[20].mxu1 }
 0x29c   :  { %v2466_v60 = vpop.f32.mrb[21].mxu1 }
 0x29d   :  { %v2467_v61 = vadd.f32 %v2466_v60, %v2465_v59  ;;  %v2468_v62 = vpop.f32.mrb[22].mxu1  ;;  %v1461_v63 = vpack.c.bf16 %v1434_v58, %v1433_v57 }
 0x29e   :  { %v2469_v0 = vpop.f32.mrb[23].mxu1 }
 0x29f   :  { %v1339_v55 = vadd.f32 %v2467_v61, %v3616_v1  ;;  %v2470_v2 = vadd.f32 %v2469_v0, %v2468_v62  ;;  %1654 = vmatmul.mubr.bf16.gmra.mrb[80].mxu1 %v1461_v63 }
 0x2a0   :  { %1663 = vmatprep.mubr.bf16.mxu1 %v3092_v16 }
 0x2a1   :  { %v1342_v3 = vadd.f32 %v2470_v2, %v3616_v1  ;;  %v1435_v56 = vmax.f32 %v1339_v55, 0.0 }
 0x2a3   :  { %v1436_v4 = vmax.f32 %v1342_v3, 0.0  ;;  %v2471_v5 = vpop.f32.mrb[24].mxu1 }
 0x2a4   :  { %v2472_v6 = vpop.f32.mrb[25].mxu1 }
 0x2a5   :  { %v2473_v7 = vadd.f32 %v2472_v6, %v2471_v5  ;;  %v2474_v8 = vpop.f32.mrb[26].mxu1  ;;  %v1462_v9 = vpack.c.bf16 %v1436_v4, %v1435_v56 }
 0x2a6   :  { %v2475_v10 = vpop.f32.mrb[27].mxu1 }
 0x2a7   :  { %v1347_v11 = vadd.f32 %v2473_v7, %v3616_v1  ;;  %v2476_v12 = vadd.f32 %v2475_v10, %v2474_v8  ;;  %1664 = vmatmul.mubr.bf16.gmra.mrb[84].mxu1 %v1462_v9 }
 0x2a8   :  { %1673 = vmatprep.mubr.bf16.mxu1 %v3092_v16 }
 0x2a9   :  { %v1350_v13 = vadd.f32 %v2476_v12, %v3616_v1  ;;  %v1437_v14 = vmax.f32 %v1347_v11, 0.0 }
 0x2ab   :  { %v1438_v15 = vmax.f32 %v1350_v13, 0.0  ;;  %v2477_v17 = vpop.f32.mrb[28].mxu1 }
 0x2ac   :  { %v2478_v18 = vpop.f32.mrb[29].mxu1 }
 0x2ad   :  { %v2479_v19 = vadd.f32 %v2478_v18, %v2477_v17  ;;  %v2480_v20 = vpop.f32.mrb[30].mxu1  ;;  %v1463_v21 = vpack.c.bf16 %v1438_v15, %v1437_v14 }
 0x2ae   :  { %v2481_v22 = vpop.f32.mrb[31].mxu1 }
 0x2af   :  { %v1355_v23 = vadd.f32 %v2479_v19, %v3616_v1  ;;  %v2482_v24 = vadd.f32 %v2481_v22, %v2480_v20  ;;  %1674 = vmatmul.mubr.bf16.gmra.mrb[88].mxu1 %v1463_v21 }
 0x2b0   :  { %1683 = vmatprep.mubr.bf16.mxu1 %v3092_v16 }
 0x2b1   :  { %v1358_v25 = vadd.f32 %v2482_v24, %v3616_v1  ;;  %v1439_v26 = vmax.f32 %v1355_v23, 0.0 }
 0x2b3   :  { %v1440_v27 = vmax.f32 %v1358_v25, 0.0  ;;  %v2483_v28 = vpop.f32.mrb[32].mxu1 }
 0x2b4   :  { %v2484_v29 = vpop.f32.mrb[33].mxu1 }
 0x2b5   :  { %v2485_v30 = vadd.f32 %v2484_v29, %v2483_v28  ;;  %v2486_v31 = vpop.f32.mrb[34].mxu1  ;;  %v1464_v32 = vpack.c.bf16 %v1440_v27, %v1439_v26 }
 0x2b6   :  { %v2487_v33 = vpop.f32.mrb[35].mxu1 }
 0x2b7   :  { %v1363_v34 = vadd.f32 %v2485_v30, %v3616_v1  ;;  %v2488_v35 = vadd.f32 %v2487_v33, %v2486_v31  ;;  %1684 = vmatmul.mubr.bf16.gmra.mrb[92].mxu1 %v1464_v32 }
 0x2b8   :  { %1693 = vmatprep.mubr.bf16.mxu1 %v3092_v16 }
 0x2b9   :  { %v1366_v36 = vadd.f32 %v2488_v35, %v3616_v1  ;;  %v1441_v37 = vmax.f32 %v1363_v34, 0.0 }
 0x2bb   :  { %v1442_v38 = vmax.f32 %v1366_v36, 0.0  ;;  %v2489_v39 = vpop.f32.mrb[36].mxu1 }
 0x2bc   :  { %v2490_v40 = vpop.f32.mrb[37].mxu1 }
 0x2bd   :  { %v2491_v41 = vadd.f32 %v2490_v40, %v2489_v39  ;;  %v2492_v42 = vpop.f32.mrb[38].mxu1  ;;  %v1465_v43 = vpack.c.bf16 %v1442_v38, %v1441_v37 }
 0x2be   :  { %v2493_v44 = vpop.f32.mrb[39].mxu1 }
 0x2bf   :  { %v1371_v45 = vadd.f32 %v2491_v41, %v3616_v1  ;;  %v2494_v46 = vadd.f32 %v2493_v44, %v2492_v42  ;;  %1694 = vmatmul.mubr.bf16.gmra.mrb[96].mxu1 %v1465_v43 }
 0x2c0   :  { %1703 = vmatprep.mubr.bf16.mxu1 %v3092_v16 }
 0x2c1   :  { %v1374_v47 = vadd.f32 %v2494_v46, %v3616_v1  ;;  %v1443_v48 = vmax.f32 %v1371_v45, 0.0 }
 0x2c3   :  { %v1444_v49 = vmax.f32 %v1374_v47, 0.0  ;;  %v2495_v50 = vpop.f32.mrb[40].mxu1 }
 0x2c4   :  { %v2496_v53 = vpop.f32.mrb[41].mxu1 }
 0x2c5   :  { %v2497_v57 = vadd.f32 %v2496_v53, %v2495_v50  ;;  %v2498_v58 = vpop.f32.mrb[42].mxu1  ;;  %v1466_v59 = vpack.c.bf16 %v1444_v49, %v1443_v48 }
 0x2c6   :  { %v2499_v60 = vpop.f32.mrb[43].mxu1 }
 0x2c7   :  { %v1379_v61 = vadd.f32 %v2497_v57, %v3616_v1  ;;  %v2500_v62 = vadd.f32 %v2499_v60, %v2498_v58  ;;  %1704 = vmatmul.mubr.bf16.gmra.mrb[100].mxu1 %v1466_v59 }
 0x2c8   :  { %1713 = vmatprep.mubr.bf16.mxu1 %v3092_v16 }
 0x2c9   :  { %v1382_v63 = vadd.f32 %v2500_v62, %v3616_v1  ;;  %v1445_v0 = vmax.f32 %v1379_v61, 0.0 }
 0x2cb   :  { %v1446_v55 = vmax.f32 %v1382_v63, 0.0  ;;  %v2501_v2 = vpop.f32.mrb[44].mxu1  ;;  %v1489_v63 = vld [vmem:[%s3938_s6] sm:$0x3] }
 0x2cc   :  { %v2502_v3 = vpop.f32.mrb[45].mxu1 }
 0x2cd   :  { %v2503_v56 = vadd.f32 %v2502_v3, %v2501_v2  ;;  %v2504_v4 = vpop.f32.mrb[46].mxu1  ;;  %v1467_v5 = vpack.c.bf16 %v1446_v55, %v1445_v0  ;;  %v3670_v0 = vrot.slane %v1489_v63, %v143_v52  ;;  %v3674_v55 = vrot.slane %v1489_v63, %v147_v54 }
 0x2ce   :  { %v2505_v6 = vpop.f32.mrb[47].mxu1 }
 0x2cf   :  { %v1387_v7 = vadd.f32 %v2503_v56, %v3616_v1  ;;  %v2506_v8 = vadd.f32 %v2505_v6, %v2504_v4  ;;  %1714 = vmatmul.mubr.bf16.gmra.mrb[104].mxu1 %v1467_v5 }
 0x2d0   :  { %1723 = vmatprep.mubr.bf16.mxu1 %v3092_v16 }
 0x2d1   :  { %v1390_v9 = vadd.f32 %v2506_v8, %v3616_v1  ;;  %v1447_v10 = vmax.f32 %v1387_v7, 0.0 }
 0x2d3   :  { %v1448_v11 = vmax.f32 %v1390_v9, 0.0  ;;  %v2507_v12 = vpop.f32.mrb[48].mxu1 }
 0x2d4   :  { %v2508_v13 = vpop.f32.mrb[49].mxu1 }
 0x2d5   :  { %v2509_v14 = vadd.f32 %v2508_v13, %v2507_v12  ;;  %v2510_v15 = vpop.f32.mrb[50].mxu1  ;;  %v1468_v17 = vpack.c.bf16 %v1448_v11, %v1447_v10 }
 0x2d6   :  { %v2511_v18 = vpop.f32.mrb[51].mxu1 }
 0x2d7   :  { %v1395_v19 = vadd.f32 %v2509_v14, %v3616_v1  ;;  %v2512_v20 = vadd.f32 %v2511_v18, %v2510_v15  ;;  %1724 = vmatmul.mubr.bf16.gmra.mrb[108].mxu1 %v1468_v17 }
 0x2d8   :  { %1733 = vmatprep.mubr.bf16.mxu1 %v3092_v16 }
 0x2d9   :  { %v1398_v21 = vadd.f32 %v2512_v20, %v3616_v1  ;;  %v1449_v22 = vmax.f32 %v1395_v19, 0.0 }
 0x2db   :  { %v1450_v23 = vmax.f32 %v1398_v21, 0.0  ;;  %v2513_v24 = vpop.f32.mrb[52].mxu1 }
 0x2dc   :  { %v2514_v25 = vpop.f32.mrb[53].mxu1 }
 0x2dd   :  { %v2515_v26 = vadd.f32 %v2514_v25, %v2513_v24  ;;  %v2516_v27 = vpop.f32.mrb[54].mxu1  ;;  %v1469_v28 = vpack.c.bf16 %v1450_v23, %v1449_v22 }
 0x2de   :  { %v2517_v29 = vpop.f32.mrb[55].mxu1 }
 0x2df   :  { %v1403_v30 = vadd.f32 %v2515_v26, %v3616_v1  ;;  %v2518_v31 = vadd.f32 %v2517_v29, %v2516_v27  ;;  %1734 = vmatmul.mubr.bf16.gmra.mrb[112].mxu1 %v1469_v28 }
 0x2e0   :  { %1743 = vmatprep.mubr.bf16.mxu1 %v3092_v16 }
 0x2e1   :  { %v1406_v32 = vadd.f32 %v2518_v31, %v3616_v1  ;;  %v1451_v33 = vmax.f32 %v1403_v30, 0.0 }
 0x2e3   :  { %v1452_v34 = vmax.f32 %v1406_v32, 0.0  ;;  %v2519_v35 = vpop.f32.mrb[56].mxu1 }
 0x2e4   :  { %v2520_v36 = vpop.f32.mrb[57].mxu1 }
 0x2e5   :  { %v2521_v37 = vadd.f32 %v2520_v36, %v2519_v35  ;;  %v2522_v38 = vpop.f32.mrb[58].mxu1  ;;  %v1470_v39 = vpack.c.bf16 %v1452_v34, %v1451_v33 }
 0x2e6   :  { %v2523_v40 = vpop.f32.mrb[59].mxu1 }
 0x2e7   :  { %v1411_v41 = vadd.f32 %v2521_v37, %v3616_v1  ;;  %v2524_v42 = vadd.f32 %v2523_v40, %v2522_v38  ;;  %1744 = vmatmul.mubr.bf16.gmra.mrb[116].mxu1 %v1470_v39 }
 0x2e8   :  { %1753 = vmatprep.mubr.bf16.mxu1 %v3092_v16 }
 0x2e9   :  { %v1414_v43 = vadd.f32 %v2524_v42, %v3616_v1  ;;  %v1453_v44 = vmax.f32 %v1411_v41, 0.0 }
 0x2eb   :  { %v1454_v45 = vmax.f32 %v1414_v43, 0.0  ;;  %v2525_v46 = vpop.f32.mrb[60].mxu1 }
 0x2ec   :  { %v2526_v47 = vpop.f32.mrb[61].mxu1 }
 0x2ed   :  { %v2527_v48 = vadd.f32 %v2526_v47, %v2525_v46  ;;  %v2528_v49 = vpop.f32.mrb[62].mxu1  ;;  %v1471_v50 = vpack.c.bf16 %v1454_v45, %v1453_v44 }
 0x2ee   :  { %v2529_v53 = vpop.f32.mrb[63].mxu1 }
 0x2ef   :  { %v1419_v57 = vadd.f32 %v2527_v48, %v3616_v1  ;;  %v2530_v58 = vadd.f32 %v2529_v53, %v2528_v49  ;;  %1754 = vmatmul.mubr.bf16.gmra.mrb[120].mxu1 %v1471_v50 }
 0x2f0   :  { %1763 = vmatprep.mubr.bf16.mxu1 %v3092_v16 }
 0x2f1   :  { %v1422_v59 = vadd.f32 %v2530_v58, %v3616_v1  ;;  %v1455_v60 = vmax.f32 %v1419_v57, 0.0 }
 0x2f3   :  { %v1456_v61 = vmax.f32 %v1422_v59, 0.0 }
 0x2f5   :  { %v1472_v62 = vpack.c.bf16 %v1456_v61, %v1455_v60 }
 0x2f7   :  { %1764 = vmatmul.mubr.bf16.gmra.mrb[124].mxu1 %v1472_v62 }
 0x352   :  { %v1615_v2 = vpop.f32.mrb[64].mxu1 }
 0x353   :  { %v1616_v16 = vadd.f32 %v1615_v2, %v3670_v0  ;;  %v1617_v1 = vpop.f32.mrb[65].mxu1 }
 0x354   :  { %v1618_v3 = vadd.f32 %v1617_v1, %v3674_v55  ;;  %v1619_v56 = vpop.f32.mrb[66].mxu1 }
 0x355   :  { %v2355_v4 = vmul.f32 -1.442695, %v1616_v16  ;;  %v1620_v5 = vadd.f32 %v1619_v56, %v3670_v0  ;;  %v1621_v6 = vpop.f32.mrb[67].mxu1 }
 0x356   :  { %v2356_v7 = vmul.f32 -1.442695, %v1618_v3  ;;  %v1622_v8 = vadd.f32 %v1621_v6, %v3674_v55 }
 0x357   :  { %2836 = vpow2.f32 %v2355_v4  ;;  %v2357_v52 = vmul.f32 -1.442695, %v1620_v5 }
 0x358   :  { %2838 = vpow2.f32 %v2356_v7  ;;  %v2358_v51 = vmul.f32 -1.442695, %v1622_v8 }
 0x359   :  { %2840 = vpow2.f32 %v2357_v52 }
 0x35a   :  { %2842 = vpow2.f32 %v2358_v51  ;;  %v1625_v54 = vpop.f32.mrb[68].mxu1 }
 0x35b   :  { %v1626_v9 = vadd.f32 %v1625_v54, %v3670_v0  ;;  %v1627_v10 = vpop.f32.mrb[69].mxu1 }
 0x35c   :  { %v1628_v11 = vadd.f32 %v1627_v10, %v3674_v55  ;;  %v1629_v12 = vpop.f32.mrb[70].mxu1 }
 0x35d   :  { %v2359_v13 = vmul.f32 -1.442695, %v1626_v9  ;;  %v1630_v14 = vadd.f32 %v1629_v12, %v3670_v0  ;;  %v1631_v15 = vpop.f32.mrb[71].mxu1 }
 0x35e   :  { %v2360_v17 = vmul.f32 -1.442695, %v1628_v11  ;;  %v1632_v18 = vadd.f32 %v1631_v15, %v3674_v55 }
 0x35f   :  { %2844 = vpow2.f32 %v2359_v13  ;;  %v2361_v19 = vmul.f32 -1.442695, %v1630_v14 }
 0x360   :  { %2846 = vpow2.f32 %v2360_v17  ;;  %v2362_v20 = vmul.f32 -1.442695, %v1632_v18 }
 0x361   :  { %v2837_v21 = vpop.eup %2836  ;;  %2848 = vpow2.f32 %v2361_v19 }
 0x362   :  { %v2839_v22 = vpop.eup %2838  ;;  %v1966_v23 = vadd.f32 1.0, %v2837_v21  ;;  %2850 = vpow2.f32 %v2362_v20  ;;  %v1635_v24 = vpop.f32.mrb[72].mxu1 }
 0x363   :  { %v2841_v25 = vpop.eup %2840  ;;  %v1967_v26 = vadd.f32 1.0, %v2839_v22  ;;  %v1636_v27 = vadd.f32 %v1635_v24, %v3670_v0  ;;  %v1637_v28 = vpop.f32.mrb[73].mxu1 }
 0x364   :  { %v2843_v29 = vpop.eup %2842  ;;  %2852 = vrcp.f32 %v1966_v23  ;;  %v1968_v30 = vadd.f32 1.0, %v2841_v25  ;;  %v1638_v31 = vadd.f32 %v1637_v28, %v3674_v55  ;;  %v1639_v32 = vpop.f32.mrb[74].mxu1 }
 0x365   :  { %2854 = vrcp.f32 %v1967_v26  ;;  %v1969_v33 = vadd.f32 1.0, %v2843_v29  ;;  %v2363_v34 = vmul.f32 -1.442695, %v1636_v27  ;;  %v1640_v35 = vadd.f32 %v1639_v32, %v3670_v0  ;;  %v1641_v36 = vpop.f32.mrb[75].mxu1 }
 0x366   :  { %2856 = vrcp.f32 %v1968_v30  ;;  %v2364_v37 = vmul.f32 -1.442695, %v1638_v31  ;;  %v1642_v38 = vadd.f32 %v1641_v36, %v3674_v55 }
 0x367   :  { %2858 = vrcp.f32 %v1969_v33  ;;  %v2365_v39 = vmul.f32 -1.442695, %v1640_v35 }
 0x368   :  { %2860 = vpow2.f32 %v2363_v34  ;;  %v2366_v40 = vmul.f32 -1.442695, %v1642_v38 }
 0x369   :  { %v2845_v41 = vpop.eup %2844  ;;  %2862 = vpow2.f32 %v2364_v37 }
 0x36a   :  { %v2847_v42 = vpop.eup %2846  ;;  %v1970_v43 = vadd.f32 1.0, %v2845_v41  ;;  %2864 = vpow2.f32 %v2365_v39  ;;  %v1645_v44 = vpop.f32.mrb[76].mxu1 }
 0x36b   :  { %v2849_v45 = vpop.eup %2848  ;;  %v1971_v46 = vadd.f32 1.0, %v2847_v42  ;;  %2866 = vpow2.f32 %v2366_v40  ;;  %v1646_v47 = vadd.f32 %v1645_v44, %v3670_v0  ;;  %v1647_v48 = vpop.f32.mrb[77].mxu1 }
 0x36c   :  { %v2851_v49 = vpop.eup %2850  ;;  %2868 = vrcp.f32 %v1970_v43  ;;  %v1972_v50 = vadd.f32 1.0, %v2849_v45  ;;  %v1648_v53 = vadd.f32 %v1647_v48, %v3674_v55  ;;  %v1649_v57 = vpop.f32.mrb[78].mxu1 }
 0x36d   :  { %2870 = vrcp.f32 %v1971_v46  ;;  %v1973_v58 = vadd.f32 1.0, %v2851_v49  ;;  %v2367_v59 = vmul.f32 -1.442695, %v1646_v47  ;;  %v1650_v60 = vadd.f32 %v1649_v57, %v3670_v0  ;;  %v1651_v61 = vpop.f32.mrb[79].mxu1 }
 0x36e   :  { %v2853_v62 = vpop.eup %2852  ;;  %2872 = vrcp.f32 %v1972_v50  ;;  %v2368_v63 = vmul.f32 -1.442695, %v1648_v53  ;;  %v1652_v2 = vadd.f32 %v1651_v61, %v3674_v55 }
 0x36f   :  { %v2855_v16 = vpop.eup %2854  ;;  %2158 = vst [vmem:[%s3939_s7] sm:$0xff] %v2853_v62  ;;  %2874 = vrcp.f32 %v1973_v58  ;;  %v2369_v1 = vmul.f32 -1.442695, %v1650_v60 }
 0x370   :  { %v2857_v3 = vpop.eup %2856  ;;  %2159 = vst [vmem:[%s3939_s7 + $0x8] sm:$0xff] %v2855_v16  ;;  %2876 = vpow2.f32 %v2367_v59  ;;  %v2370_v56 = vmul.f32 -1.442695, %v1652_v2 }
 0x371   :  { %v2859_v4 = vpop.eup %2858  ;;  %2160 = vst [vmem:[%s3939_s7 + $0x10] sm:$0xff] %v2857_v3  ;;  %2878 = vpow2.f32 %v2368_v63 }
 0x372   :  { %v2861_v5 = vpop.eup %2860  ;;  %2161 = vst [vmem:[%s3939_s7 + $0x18] sm:$0xff] %v2859_v4  ;;  %2880 = vpow2.f32 %v2369_v1  ;;  %v1655_v6 = vpop.f32.mrb[80].mxu1 }
 0x373   :  { %v2863_v7 = vpop.eup %2862  ;;  %v1974_v8 = vadd.f32 1.0, %v2861_v5  ;;  %2882 = vpow2.f32 %v2370_v56  ;;  %v1656_v52 = vadd.f32 %v1655_v6, %v3670_v0  ;;  %v1657_v51 = vpop.f32.mrb[81].mxu1 }
 0x374   :  { %v2865_v54 = vpop.eup %2864  ;;  %v1975_v9 = vadd.f32 1.0, %v2863_v7  ;;  %v1658_v10 = vadd.f32 %v1657_v51, %v3674_v55  ;;  %v1659_v11 = vpop.f32.mrb[82].mxu1 }
 0x375   :  { %v2867_v12 = vpop.eup %2866  ;;  %2884 = vrcp.f32 %v1974_v8  ;;  %v1976_v13 = vadd.f32 1.0, %v2865_v54  ;;  %v2371_v14 = vmul.f32 -1.442695, %v1656_v52  ;;  %v1660_v15 = vadd.f32 %v1659_v11, %v3670_v0  ;;  %v1661_v17 = vpop.f32.mrb[83].mxu1 }
 0x376   :  { %v2869_v18 = vpop.eup %2868  ;;  %2886 = vrcp.f32 %v1975_v9  ;;  %v1977_v19 = vadd.f32 1.0, %v2867_v12  ;;  %v2372_v20 = vmul.f32 -1.442695, %v1658_v10  ;;  %v1662_v21 = vadd.f32 %v1661_v17, %v3674_v55 }
 0x377   :  { %v2871_v22 = vpop.eup %2870  ;;  %2162 = vst [vmem:[%s3939_s7 + $0x20] sm:$0xff] %v2869_v18  ;;  %2888 = vrcp.f32 %v1976_v13  ;;  %v2373_v23 = vmul.f32 -1.442695, %v1660_v15 }
 0x378   :  { %v2873_v24 = vpop.eup %2872  ;;  %2163 = vst [vmem:[%s3939_s7 + $0x28] sm:$0xff] %v2871_v22  ;;  %2890 = vrcp.f32 %v1977_v19  ;;  %v2374_v25 = vmul.f32 -1.442695, %v1662_v21 }
 0x379   :  { %v2875_v26 = vpop.eup %2874  ;;  %2164 = vst [vmem:[%s3939_s7 + $0x30] sm:$0xff] %v2873_v24  ;;  %2892 = vpow2.f32 %v2371_v14 }
 0x37a   :  { %v2877_v27 = vpop.eup %2876  ;;  %2165 = vst [vmem:[%s3939_s7 + $0x38] sm:$0xff] %v2875_v26  ;;  %2894 = vpow2.f32 %v2372_v20  ;;  %v1665_v28 = vpop.f32.mrb[84].mxu1 }
 0x37b   :  { %v2879_v29 = vpop.eup %2878  ;;  %v1978_v30 = vadd.f32 1.0, %v2877_v27  ;;  %2896 = vpow2.f32 %v2373_v23  ;;  %v1666_v31 = vadd.f32 %v1665_v28, %v3670_v0  ;;  %v1667_v32 = vpop.f32.mrb[85].mxu1 }
 0x37c   :  { %v2881_v33 = vpop.eup %2880  ;;  %v1979_v34 = vadd.f32 1.0, %v2879_v29  ;;  %2898 = vpow2.f32 %v2374_v25  ;;  %v1668_v35 = vadd.f32 %v1667_v32, %v3674_v55  ;;  %v1669_v36 = vpop.f32.mrb[86].mxu1 }
 0x37d   :  { %v2883_v37 = vpop.eup %2882  ;;  %2900 = vrcp.f32 %v1978_v30  ;;  %v1980_v38 = vadd.f32 1.0, %v2881_v33  ;;  %v2375_v39 = vmul.f32 -1.442695, %v1666_v31  ;;  %v1670_v40 = vadd.f32 %v1669_v36, %v3670_v0  ;;  %v1671_v41 = vpop.f32.mrb[87].mxu1 }
 0x37e   :  { %2902 = vrcp.f32 %v1979_v34  ;;  %v1981_v42 = vadd.f32 1.0, %v2883_v37  ;;  %v2376_v43 = vmul.f32 -1.442695, %v1668_v35  ;;  %v1672_v44 = vadd.f32 %v1671_v41, %v3674_v55 }
 0x37f   :  { %v2885_v45 = vpop.eup %2884  ;;  %2904 = vrcp.f32 %v1980_v38  ;;  %v2377_v46 = vmul.f32 -1.442695, %v1670_v40 }
 0x380   :  { %v2887_v47 = vpop.eup %2886  ;;  %2166 = vst [vmem:[%s3939_s7 + $0x40] sm:$0xff] %v2885_v45  ;;  %2906 = vrcp.f32 %v1981_v42  ;;  %v2378_v48 = vmul.f32 -1.442695, %v1672_v44 }
 0x381   :  { %v2889_v49 = vpop.eup %2888  ;;  %2167 = vst [vmem:[%s3939_s7 + $0x48] sm:$0xff] %v2887_v47  ;;  %2908 = vpow2.f32 %v2375_v39 }
 0x382   :  { %v2891_v50 = vpop.eup %2890  ;;  %2168 = vst [vmem:[%s3939_s7 + $0x50] sm:$0xff] %v2889_v49  ;;  %2910 = vpow2.f32 %v2376_v43  ;;  %v1675_v53 = vpop.f32.mrb[88].mxu1 }
 0x383   :  { %v2893_v57 = vpop.eup %2892  ;;  %2169 = vst [vmem:[%s3939_s7 + $0x58] sm:$0xff] %v2891_v50  ;;  %2912 = vpow2.f32 %v2377_v46  ;;  %v1676_v58 = vadd.f32 %v1675_v53, %v3670_v0  ;;  %v1677_v59 = vpop.f32.mrb[89].mxu1 }
 0x384   :  { %v2895_v60 = vpop.eup %2894  ;;  %v1982_v61 = vadd.f32 1.0, %v2893_v57  ;;  %2914 = vpow2.f32 %v2378_v48  ;;  %v1678_v62 = vadd.f32 %v1677_v59, %v3674_v55  ;;  %v1679_v63 = vpop.f32.mrb[90].mxu1 }
 0x385   :  { %v2897_v2 = vpop.eup %2896  ;;  %v1983_v16 = vadd.f32 1.0, %v2895_v60  ;;  %v1680_v1 = vadd.f32 %v1679_v63, %v3670_v0  ;;  %v1681_v3 = vpop.f32.mrb[91].mxu1  ;;  %v2379_v5 = vmul.f32 -1.442695, %v1676_v58 }
 0x386   :  { %v2899_v56 = vpop.eup %2898  ;;  %2916 = vrcp.f32 %v1982_v61  ;;  %v1984_v4 = vadd.f32 1.0, %v2897_v2  ;;  %v1682_v6 = vadd.f32 %v1681_v3, %v3674_v55  ;;  %v2380_v52 = vmul.f32 -1.442695, %v1678_v62 }
 0x387   :  { %v2901_v7 = vpop.eup %2900  ;;  %2918 = vrcp.f32 %v1983_v16  ;;  %v1985_v8 = vadd.f32 1.0, %v2899_v56  ;;  %v2381_v54 = vmul.f32 -1.442695, %v1680_v1 }
 0x388   :  { %v2903_v51 = vpop.eup %2902  ;;  %2170 = vst [vmem:[%s3939_s7 + $0x60] sm:$0xff] %v2901_v7  ;;  %2920 = vrcp.f32 %v1984_v4  ;;  %v2382_v10 = vmul.f32 -1.442695, %v1682_v6 }
 0x389   :  { %v2905_v9 = vpop.eup %2904  ;;  %2171 = vst [vmem:[%s3939_s7 + $0x68] sm:$0xff] %v2903_v51  ;;  %2922 = vrcp.f32 %v1985_v8 }
 0x38a   :  { %v2907_v11 = vpop.eup %2906  ;;  %2172 = vst [vmem:[%s3939_s7 + $0x70] sm:$0xff] %v2905_v9  ;;  %2924 = vpow2.f32 %v2379_v5  ;;  %v1685_v12 = vpop.f32.mrb[92].mxu1 }
 0x38b   :  { %v2909_v13 = vpop.eup %2908  ;;  %2173 = vst [vmem:[%s3939_s7 + $0x78] sm:$0xff] %v2907_v11  ;;  %2926 = vpow2.f32 %v2380_v52  ;;  %v1686_v14 = vadd.f32 %v1685_v12, %v3670_v0  ;;  %v1687_v15 = vpop.f32.mrb[93].mxu1 }
 0x38c   :  { %v2911_v17 = vpop.eup %2910  ;;  %v1986_v18 = vadd.f32 1.0, %v2909_v13  ;;  %2928 = vpow2.f32 %v2381_v54  ;;  %v1688_v19 = vadd.f32 %v1687_v15, %v3674_v55  ;;  %v1689_v20 = vpop.f32.mrb[94].mxu1 }
 0x38d   :  { %v2913_v21 = vpop.eup %2912  ;;  %v1987_v22 = vadd.f32 1.0, %v2911_v17  ;;  %2930 = vpow2.f32 %v2382_v10  ;;  %v1690_v23 = vadd.f32 %v1689_v20, %v3670_v0  ;;  %v1691_v24 = vpop.f32.mrb[95].mxu1  ;;  %v2383_v27 = vmul.f32 -1.442695, %v1686_v14 }
 0x38e   :  { %v2915_v25 = vpop.eup %2914  ;;  %2932 = vrcp.f32 %v1986_v18  ;;  %v1988_v26 = vadd.f32 1.0, %v2913_v21  ;;  %v1692_v28 = vadd.f32 %v1691_v24, %v3674_v55  ;;  %v2384_v30 = vmul.f32 -1.442695, %v1688_v19 }
 0x38f   :  { %2934 = vrcp.f32 %v1987_v22  ;;  %v1989_v29 = vadd.f32 1.0, %v2915_v25  ;;  %v2385_v32 = vmul.f32 -1.442695, %v1690_v23 }
 0x390   :  { %v2917_v31 = vpop.eup %2916  ;;  %2936 = vrcp.f32 %v1988_v26  ;;  %v2386_v34 = vmul.f32 -1.442695, %v1692_v28 }
 0x391   :  { %v2919_v33 = vpop.eup %2918  ;;  %2174 = vst [vmem:[%s3939_s7 + $0x80] sm:$0xff] %v2917_v31  ;;  %2938 = vrcp.f32 %v1989_v29 }
 0x392   :  { %v2921_v35 = vpop.eup %2920  ;;  %2175 = vst [vmem:[%s3939_s7 + $0x88] sm:$0xff] %v2919_v33  ;;  %2940 = vpow2.f32 %v2383_v27  ;;  %v1695_v36 = vpop.f32.mrb[96].mxu1 }
 0x393   :  { %v2923_v37 = vpop.eup %2922  ;;  %2176 = vst [vmem:[%s3939_s7 + $0x90] sm:$0xff] %v2921_v35  ;;  %2942 = vpow2.f32 %v2384_v30  ;;  %v1696_v38 = vadd.f32 %v1695_v36, %v3670_v0  ;;  %v1697_v39 = vpop.f32.mrb[97].mxu1 }
 0x394   :  { %v2925_v40 = vpop.eup %2924  ;;  %2177 = vst [vmem:[%s3939_s7 + $0x98] sm:$0xff] %v2923_v37  ;;  %2944 = vpow2.f32 %v2385_v32  ;;  %v1698_v41 = vadd.f32 %v1697_v39, %v3674_v55  ;;  %v1699_v42 = vpop.f32.mrb[98].mxu1 }
 0x395   :  { %v2927_v43 = vpop.eup %2926  ;;  %v1990_v44 = vadd.f32 1.0, %v2925_v40  ;;  %2946 = vpow2.f32 %v2386_v34  ;;  %v1700_v45 = vadd.f32 %v1699_v42, %v3670_v0  ;;  %v1701_v46 = vpop.f32.mrb[99].mxu1  ;;  %v2387_v57 = vmul.f32 -1.442695, %v1696_v38 }
 0x396   :  { %v2929_v47 = vpop.eup %2928  ;;  %v1991_v48 = vadd.f32 1.0, %v2927_v43  ;;  %v1702_v49 = vadd.f32 %v1701_v46, %v3674_v55  ;;  %v2388_v60 = vmul.f32 -1.442695, %v1698_v41 }
 0x397   :  { %v2931_v50 = vpop.eup %2930  ;;  %2948 = vrcp.f32 %v1990_v44  ;;  %v1992_v53 = vadd.f32 1.0, %v2929_v47  ;;  %v2389_v62 = vmul.f32 -1.442695, %v1700_v45 }
 0x398   :  { %v2933_v58 = vpop.eup %2932  ;;  %2950 = vrcp.f32 %v1991_v48  ;;  %v1993_v59 = vadd.f32 1.0, %v2931_v50  ;;  %v2390_v2 = vmul.f32 -1.442695, %v1702_v49 }
 0x399   :  { %v2935_v61 = vpop.eup %2934  ;;  %2178 = vst [vmem:[%s3939_s7 + $0xa0] sm:$0xff] %v2933_v58  ;;  %2952 = vrcp.f32 %v1992_v53 }
 0x39a   :  { %v2937_v63 = vpop.eup %2936  ;;  %2179 = vst [vmem:[%s3939_s7 + $0xa8] sm:$0xff] %v2935_v61  ;;  %2954 = vrcp.f32 %v1993_v59  ;;  %v1705_v16 = vpop.f32.mrb[100].mxu1 }
 0x39b   :  { %v2939_v1 = vpop.eup %2938  ;;  %2180 = vst [vmem:[%s3939_s7 + $0xb0] sm:$0xff] %v2937_v63  ;;  %2956 = vpow2.f32 %v2387_v57  ;;  %v1706_v3 = vadd.f32 %v1705_v16, %v3670_v0  ;;  %v1707_v56 = vpop.f32.mrb[101].mxu1 }
 0x39c   :  { %v2941_v4 = vpop.eup %2940  ;;  %2181 = vst [vmem:[%s3939_s7 + $0xb8] sm:$0xff] %v2939_v1  ;;  %2958 = vpow2.f32 %v2388_v60  ;;  %v1708_v5 = vadd.f32 %v1707_v56, %v3674_v55  ;;  %v1709_v6 = vpop.f32.mrb[102].mxu1 }
 0x39d   :  { %v2943_v7 = vpop.eup %2942  ;;  %v1994_v8 = vadd.f32 1.0, %v2941_v4  ;;  %2960 = vpow2.f32 %v2389_v62  ;;  %v1710_v52 = vadd.f32 %v1709_v6, %v3670_v0  ;;  %v1711_v51 = vpop.f32.mrb[103].mxu1  ;;  %v2391_v13 = vmul.f32 -1.442695, %v1706_v3 }
 0x39e   :  { %v2945_v54 = vpop.eup %2944  ;;  %v1995_v9 = vadd.f32 1.0, %v2943_v7  ;;  %2962 = vpow2.f32 %v2390_v2  ;;  %v1712_v10 = vadd.f32 %v1711_v51, %v3674_v55  ;;  %v2392_v15 = vmul.f32 -1.442695, %v1708_v5 }
 0x39f   :  { %v2947_v11 = vpop.eup %2946  ;;  %2964 = vrcp.f32 %v1994_v8  ;;  %v1996_v12 = vadd.f32 1.0, %v2945_v54  ;;  %v2393_v18 = vmul.f32 -1.442695, %v1710_v52 }
 0x3a0   :  { %2966 = vrcp.f32 %v1995_v9  ;;  %v1997_v14 = vadd.f32 1.0, %v2947_v11  ;;  %v2394_v20 = vmul.f32 -1.442695, %v1712_v10 }
 0x3a1   :  { %v2949_v17 = vpop.eup %2948  ;;  %2968 = vrcp.f32 %v1996_v12 }
 0x3a2   :  { %v2951_v19 = vpop.eup %2950  ;;  %2182 = vst [vmem:[%s3939_s7 + $0xc0] sm:$0xff] %v2949_v17  ;;  %2970 = vrcp.f32 %v1997_v14  ;;  %v1715_v21 = vpop.f32.mrb[104].mxu1 }
 0x3a3   :  { %v2953_v22 = vpop.eup %2952  ;;  %2183 = vst [vmem:[%s3939_s7 + $0xc8] sm:$0xff] %v2951_v19  ;;  %2972 = vpow2.f32 %v2391_v13  ;;  %v1716_v23 = vadd.f32 %v1715_v21, %v3670_v0  ;;  %v1717_v24 = vpop.f32.mrb[105].mxu1 }
 0x3a4   :  { %v2955_v25 = vpop.eup %2954  ;;  %2184 = vst [vmem:[%s3939_s7 + $0xd0] sm:$0xff] %v2953_v22  ;;  %2974 = vpow2.f32 %v2392_v15  ;;  %v1718_v26 = vadd.f32 %v1717_v24, %v3674_v55  ;;  %v1719_v27 = vpop.f32.mrb[106].mxu1 }
 0x3a5   :  { %v2957_v28 = vpop.eup %2956  ;;  %2185 = vst [vmem:[%s3939_s7 + $0xd8] sm:$0xff] %v2955_v25  ;;  %2976 = vpow2.f32 %v2393_v18  ;;  %v2395_v29 = vmul.f32 -1.442695, %v1716_v23  ;;  %v1720_v30 = vadd.f32 %v1719_v27, %v3670_v0  ;;  %v1721_v31 = vpop.f32.mrb[107].mxu1 }
 0x3a6   :  { %v2959_v32 = vpop.eup %2958  ;;  %v1998_v33 = vadd.f32 1.0, %v2957_v28  ;;  %2978 = vpow2.f32 %v2394_v20  ;;  %v1722_v34 = vadd.f32 %v1721_v31, %v3674_v55  ;;  %v2396_v39 = vmul.f32 -1.442695, %v1718_v26 }
 0x3a7   :  { %v2961_v35 = vpop.eup %2960  ;;  %v1999_v36 = vadd.f32 1.0, %v2959_v32  ;;  %2980 = vpow2.f32 %v2395_v29  ;;  %v2397_v42 = vmul.f32 -1.442695, %v1720_v30 }
 0x3a8   :  { %v2963_v37 = vpop.eup %2962  ;;  %2982 = vrcp.f32 %v1998_v33  ;;  %v2000_v38 = vadd.f32 1.0, %v2961_v35  ;;  %v2398_v44 = vmul.f32 -1.442695, %v1722_v34 }
 0x3a9   :  { %v2965_v40 = vpop.eup %2964  ;;  %2984 = vrcp.f32 %v1999_v36  ;;  %v2001_v41 = vadd.f32 1.0, %v2963_v37 }
 0x3aa   :  { %v2967_v43 = vpop.eup %2966  ;;  %2186 = vst [vmem:[%s3939_s7 + $0xe0] sm:$0xff] %v2965_v40  ;;  %2986 = vrcp.f32 %v2000_v38  ;;  %v1725_v45 = vpop.f32.mrb[108].mxu1 }
 0x3ab   :  { %v2969_v46 = vpop.eup %2968  ;;  %2187 = vst [vmem:[%s3939_s7 + $0xe8] sm:$0xff] %v2967_v43  ;;  %2988 = vrcp.f32 %v2001_v41  ;;  %v1726_v47 = vadd.f32 %v1725_v45, %v3670_v0  ;;  %v1727_v48 = vpop.f32.mrb[109].mxu1 }
 0x3ac   :  { %v2971_v49 = vpop.eup %2970  ;;  %2188 = vst [vmem:[%s3939_s7 + $0xf0] sm:$0xff] %v2969_v46  ;;  %2990 = vpow2.f32 %v2396_v39  ;;  %v1729_v50 = vpop.f32.mrb[110].mxu1  ;;  %v1728_v58 = vadd.f32 %v1727_v48, %v3674_v55 }
 0x3ad   :  { %v2973_v53 = vpop.eup %2972  ;;  %2189 = vst [vmem:[%s3939_s7 + $0xf8] sm:$0xff] %v2971_v49  ;;  %2992 = vpow2.f32 %v2397_v42  ;;  %v2399_v57 = vmul.f32 -1.442695, %v1726_v47  ;;  %v1731_v59 = vpop.f32.mrb[111].mxu1  ;;  %v1730_v62 = vadd.f32 %v1729_v50, %v3670_v0 }
 0x3ae   :  { %v2975_v60 = vpop.eup %2974  ;;  %v2002_v61 = vadd.f32 1.0, %v2973_v53  ;;  %2994 = vpow2.f32 %v2398_v44  ;;  %v1732_v16 = vadd.f32 %v1731_v59, %v3674_v55  ;;  %v2400_v5 = vmul.f32 -1.442695, %v1728_v58 }
 0x3af   :  { %v2977_v63 = vpop.eup %2976  ;;  %v2003_v2 = vadd.f32 1.0, %v2975_v60  ;;  %2996 = vpow2.f32 %v2399_v57  ;;  %v2401_v8 = vmul.f32 -1.442695, %v1730_v62 }
 0x3b0   :  { %v2979_v1 = vpop.eup %2978  ;;  %2998 = vrcp.f32 %v2002_v61  ;;  %v2004_v3 = vadd.f32 1.0, %v2977_v63  ;;  %v2402_v54 = vmul.f32 -1.442695, %v1732_v16 }
 0x3b1   :  { %v2981_v56 = vpop.eup %2980  ;;  %3000 = vrcp.f32 %v2003_v2  ;;  %v2005_v4 = vadd.f32 1.0, %v2979_v1 }
 0x3b2   :  { %v2983_v6 = vpop.eup %2982  ;;  %3002 = vrcp.f32 %v2004_v3  ;;  %v2006_v7 = vadd.f32 1.0, %v2981_v56  ;;  %v1735_v52 = vpop.f32.mrb[112].mxu1 }
 0x3b3   :  { %v2985_v51 = vpop.eup %2984  ;;  %2190 = vst [vmem:[%s3939_s7 + $0x100] sm:$0xff] %v2983_v6  ;;  %3004 = vrcp.f32 %v2005_v4  ;;  %v1736_v9 = vadd.f32 %v1735_v52, %v3670_v0  ;;  %v1737_v10 = vpop.f32.mrb[113].mxu1 }
 0x3b4   :  { %v2987_v11 = vpop.eup %2986  ;;  %2191 = vst [vmem:[%s3939_s7 + $0x108] sm:$0xff] %v2985_v51  ;;  %3006 = vrcp.f32 %v2006_v7  ;;  %v1739_v12 = vpop.f32.mrb[114].mxu1  ;;  %v1738_v15 = vadd.f32 %v1737_v10, %v3674_v55 }
 0x3b5   :  { %v2989_v13 = vpop.eup %2988  ;;  %2192 = vst [vmem:[%s3939_s7 + $0x110] sm:$0xff] %v2987_v11  ;;  %3008 = vpow2.f32 %v2400_v5  ;;  %v2403_v14 = vmul.f32 -1.442695, %v1736_v9  ;;  %v1741_v17 = vpop.f32.mrb[115].mxu1  ;;  %v1740_v19 = vadd.f32 %v1739_v12, %v3670_v0 }
 0x3b6   :  { %v2991_v18 = vpop.eup %2990  ;;  %2193 = vst [vmem:[%s3939_s7 + $0x118] sm:$0xff] %v2989_v13  ;;  %3010 = vpow2.f32 %v2401_v8  ;;  %v1742_v22 = vadd.f32 %v1741_v17, %v3674_v55  ;;  %v2404_v27 = vmul.f32 -1.442695, %v1738_v15 }
 0x3b7   :  { %v2993_v20 = vpop.eup %2992  ;;  %v2007_v21 = vadd.f32 1.0, %v2991_v18  ;;  %3012 = vpow2.f32 %v2402_v54  ;;  %v2405_v30 = vmul.f32 -1.442695, %v1740_v19 }
 0x3b8   :  { %v2995_v23 = vpop.eup %2994  ;;  %v2008_v24 = vadd.f32 1.0, %v2993_v20  ;;  %3014 = vpow2.f32 %v2403_v14  ;;  %v2406_v33 = vmul.f32 -1.442695, %v1742_v22 }
 0x3b9   :  { %v2997_v25 = vpop.eup %2996  ;;  %3016 = vrcp.f32 %v2007_v21  ;;  %v2009_v26 = vadd.f32 1.0, %v2995_v23 }
 0x3ba   :  { %v2999_v28 = vpop.eup %2998  ;;  %3018 = vrcp.f32 %v2008_v24  ;;  %v2010_v29 = vadd.f32 1.0, %v2997_v25  ;;  %v1745_v31 = vpop.f32.mrb[116].mxu1 }
 0x3bb   :  { %v3001_v32 = vpop.eup %3000  ;;  %2194 = vst [vmem:[%s3939_s7 + $0x120] sm:$0xff] %v2999_v28  ;;  %3020 = vrcp.f32 %v2009_v26  ;;  %v1746_v34 = vadd.f32 %v1745_v31, %v3670_v0  ;;  %v1747_v35 = vpop.f32.mrb[117].mxu1 }
 0x3bc   :  { %v3003_v36 = vpop.eup %3002  ;;  %2195 = vst [vmem:[%s3939_s7 + $0x128] sm:$0xff] %v3001_v32  ;;  %3022 = vrcp.f32 %v2010_v29  ;;  %v1748_v37 = vadd.f32 %v1747_v35, %v3674_v55  ;;  %v1749_v38 = vpop.f32.mrb[118].mxu1 }
 0x3bd   :  { %v3005_v39 = vpop.eup %3004  ;;  %2196 = vst [vmem:[%s3939_s7 + $0x130] sm:$0xff] %v3003_v36  ;;  %3024 = vpow2.f32 %v2404_v27  ;;  %v2407_v40 = vmul.f32 -1.442695, %v1746_v34  ;;  %v1751_v41 = vpop.f32.mrb[119].mxu1  ;;  %v1750_v44 = vadd.f32 %v1749_v38, %v3670_v0 }
 0x3be   :  { %v3007_v42 = vpop.eup %3006  ;;  %2197 = vst [vmem:[%s3939_s7 + $0x138] sm:$0xff] %v3005_v39  ;;  %3026 = vpow2.f32 %v2405_v30  ;;  %v2408_v43 = vmul.f32 -1.442695, %v1748_v37  ;;  %v1752_v46 = vadd.f32 %v1751_v41, %v3674_v55 }
 0x3bf   :  { %v3009_v45 = vpop.eup %3008  ;;  %2198 = vst [vmem:[%s3939_s7 + $0x140] sm:$0xff] %v3007_v42  ;;  %3028 = vpow2.f32 %v2406_v33  ;;  %v2409_v58 = vmul.f32 -1.442695, %v1750_v44 }
 0x3c0   :  { %v3011_v47 = vpop.eup %3010  ;;  %v2011_v48 = vadd.f32 1.0, %v3009_v45  ;;  %3030 = vpow2.f32 %v2407_v40  ;;  %v2410_v62 = vmul.f32 -1.442695, %v1752_v46 }
 0x3c1   :  { %v3013_v49 = vpop.eup %3012  ;;  %v2012_v50 = vadd.f32 1.0, %v3011_v47  ;;  %3032 = vpow2.f32 %v2408_v43 }
 0x3c2   :  { %v3015_v53 = vpop.eup %3014  ;;  %3034 = vrcp.f32 %v2011_v48  ;;  %v2013_v57 = vadd.f32 1.0, %v3013_v49  ;;  %v1755_v59 = vpop.f32.mrb[120].mxu1 }
 0x3c3   :  { %v3017_v60 = vpop.eup %3016  ;;  %3036 = vrcp.f32 %v2012_v50  ;;  %v2014_v61 = vadd.f32 1.0, %v3015_v53  ;;  %v1756_v63 = vadd.f32 %v1755_v59, %v3670_v0  ;;  %v1757_v2 = vpop.f32.mrb[121].mxu1 }
 0x3c4   :  { %v3019_v16 = vpop.eup %3018  ;;  %2199 = vst [vmem:[%s3939_s7 + $0x148] sm:$0xff] %v3017_v60  ;;  %3038 = vrcp.f32 %v2013_v57  ;;  %v1758_v1 = vadd.f32 %v1757_v2, %v3674_v55  ;;  %v1759_v3 = vpop.f32.mrb[122].mxu1 }
 0x3c5   :  { %v3021_v56 = vpop.eup %3020  ;;  %2200 = vst [vmem:[%s3939_s7 + $0x150] sm:$0xff] %v3019_v16  ;;  %3040 = vrcp.f32 %v2014_v61  ;;  %v2411_v4 = vmul.f32 -1.442695, %v1756_v63  ;;  %v1761_v5 = vpop.f32.mrb[123].mxu1  ;;  %v1760_v52 = vadd.f32 %v1759_v3, %v3670_v0 }
 0x3c6   :  { %v3023_v6 = vpop.eup %3022  ;;  %2201 = vst [vmem:[%s3939_s7 + $0x158] sm:$0xff] %v3021_v56  ;;  %3042 = vpow2.f32 %v2409_v58  ;;  %v2412_v7 = vmul.f32 -1.442695, %v1758_v1  ;;  %v1762_v9 = vadd.f32 %v1761_v5, %v3674_v55 }
 0x3c7   :  { %v3025_v8 = vpop.eup %3024  ;;  %2202 = vst [vmem:[%s3939_s7 + $0x160] sm:$0xff] %v3023_v6  ;;  %3044 = vpow2.f32 %v2410_v62  ;;  %v2413_v18 = vmul.f32 -1.442695, %v1760_v52 }
 0x3c8   :  { %v3027_v51 = vpop.eup %3026  ;;  %v2015_v54 = vadd.f32 1.0, %v3025_v8  ;;  %3046 = vpow2.f32 %v2411_v4  ;;  %v2414_v23 = vmul.f32 -1.442695, %v1762_v9 }
 0x3c9   :  { %v3029_v10 = vpop.eup %3028  ;;  %v2016_v11 = vadd.f32 1.0, %v3027_v51  ;;  %3048 = vpow2.f32 %v2412_v7 }
 0x3ca   :  { %v3031_v12 = vpop.eup %3030  ;;  %3050 = vrcp.f32 %v2015_v54  ;;  %v2017_v13 = vadd.f32 1.0, %v3029_v10  ;;  %v1765_v14 = vpop.f32.mrb[124].mxu1 }
 0x3cb   :  { %v3033_v15 = vpop.eup %3032  ;;  %3052 = vrcp.f32 %v2016_v11  ;;  %v2018_v17 = vadd.f32 1.0, %v3031_v12  ;;  %v1766_v19 = vadd.f32 %v1765_v14, %v3670_v0  ;;  %v1767_v20 = vpop.f32.mrb[125].mxu1 }
 0x3cc   :  { %v3035_v21 = vpop.eup %3034  ;;  %3054 = vrcp.f32 %v2017_v13  ;;  %v2019_v22 = vadd.f32 1.0, %v3033_v15  ;;  %v1768_v24 = vadd.f32 %v1767_v20, %v3674_v55  ;;  %v1769_v25 = vpop.f32.mrb[126].mxu1 }
 0x3cd   :  { %v3037_v26 = vpop.eup %3036  ;;  %2203 = vst [vmem:[%s3939_s7 + $0x168] sm:$0xff] %v3035_v21  ;;  %3056 = vrcp.f32 %v2018_v17  ;;  %v2415_v27 = vmul.f32 -1.442695, %v1766_v19  ;;  %v1771_v28 = vpop.f32.mrb[127].mxu1  ;;  %v1770_v32 = vadd.f32 %v1769_v25, %v3670_v0 }
 0x3ce   :  { %v3039_v29 = vpop.eup %3038  ;;  %2204 = vst [vmem:[%s3939_s7 + $0x170] sm:$0xff] %v3037_v26  ;;  %3058 = vrcp.f32 %v2019_v22  ;;  %v2416_v30 = vmul.f32 -1.442695, %v1768_v24  ;;  %v1772_v34 = vadd.f32 %v1771_v28, %v3674_v55 }
 0x3cf   :  { %v3041_v31 = vpop.eup %3040  ;;  %2205 = vst [vmem:[%s3939_s7 + $0x178] sm:$0xff] %v3039_v29  ;;  %3060 = vpow2.f32 %v2413_v18  ;;  %v2417_v41 = vmul.f32 -1.442695, %v1770_v32 }
 0x3d0   :  { %v3043_v33 = vpop.eup %3042  ;;  %2206 = vst [vmem:[%s3939_s7 + $0x180] sm:$0xff] %v3041_v31  ;;  %3062 = vpow2.f32 %v2414_v23  ;;  %v2418_v43 = vmul.f32 -1.442695, %v1772_v34 }
 0x3d1   :  { %v3045_v35 = vpop.eup %3044  ;;  %v2020_v36 = vadd.f32 1.0, %v3043_v33  ;;  %3064 = vpow2.f32 %v2415_v27 }
 0x3d2   :  { %v3047_v37 = vpop.eup %3046  ;;  %v2021_v38 = vadd.f32 1.0, %v3045_v35  ;;  %3066 = vpow2.f32 %v2416_v30 }
 0x3d3   :  { %v3049_v39 = vpop.eup %3048  ;;  %3068 = vrcp.f32 %v2020_v36  ;;  %v2022_v40 = vadd.f32 1.0, %v3047_v37 }
 0x3d4   :  { %v3051_v42 = vpop.eup %3050  ;;  %3070 = vrcp.f32 %v2021_v38  ;;  %v2023_v0 = vadd.f32 1.0, %v3049_v39 }
 0x3d5   :  { %v3053_v44 = vpop.eup %3052  ;;  %2207 = vst [vmem:[%s3939_s7 + $0x188] sm:$0xff] %v3051_v42  ;;  %3072 = vrcp.f32 %v2022_v40 }
 0x3d6   :  { %v3055_v55 = vpop.eup %3054  ;;  %2208 = vst [vmem:[%s3939_s7 + $0x190] sm:$0xff] %v3053_v44  ;;  %3074 = vrcp.f32 %v2023_v0 }
 0x3d7   :  { %v3057_v45 = vpop.eup %3056  ;;  %2209 = vst [vmem:[%s3939_s7 + $0x198] sm:$0xff] %v3055_v55  ;;  %3076 = vpow2.f32 %v2417_v41 }
 0x3d8   :  { %v3059_v46 = vpop.eup %3058  ;;  %2210 = vst [vmem:[%s3939_s7 + $0x1a0] sm:$0xff] %v3057_v45  ;;  %3078 = vpow2.f32 %v2418_v43 }
 0x3d9   :  { %v3061_v47 = vpop.eup %3060  ;;  %2211 = vst [vmem:[%s3939_s7 + $0x1a8] sm:$0xff] %v3059_v46 }
 0x3da   :  { %v3063_v48 = vpop.eup %3062  ;;  %v2024_v49 = vadd.f32 1.0, %v3061_v47 }
 0x3db   :  { %v3065_v50 = vpop.eup %3064  ;;  %v2025_v53 = vadd.f32 1.0, %v3063_v48 }
 0x3dc   :  { %v3067_v57 = vpop.eup %3066  ;;  %3080 = vrcp.f32 %v2024_v49  ;;  %v2026_v58 = vadd.f32 1.0, %v3065_v50 }
 0x3dd   :  { %v3069_v59 = vpop.eup %3068  ;;  %3082 = vrcp.f32 %v2025_v53  ;;  %v2027_v60 = vadd.f32 1.0, %v3067_v57 }
 0x3de   :  { %v3071_v61 = vpop.eup %3070  ;;  %2212 = vst [vmem:[%s3939_s7 + $0x1b0] sm:$0xff] %v3069_v59  ;;  %3084 = vrcp.f32 %v2026_v58 }
 0x3df   :  { %v3073_v62 = vpop.eup %3072  ;;  %2213 = vst [vmem:[%s3939_s7 + $0x1b8] sm:$0xff] %v3071_v61  ;;  %3086 = vrcp.f32 %v2027_v60 }
 0x3e0   :  { %v3075_v63 = vpop.eup %3074  ;;  %2214 = vst [vmem:[%s3939_s7 + $0x1c0] sm:$0xff] %v3073_v62 }
 0x3e1   :  { %v3077_v2 = vpop.eup %3076  ;;  %2215 = vst [vmem:[%s3939_s7 + $0x1c8] sm:$0xff] %v3075_v63 }
 0x3e2   :  { %v3079_v16 = vpop.eup %3078  ;;  %v2028_v1 = vadd.f32 1.0, %v3077_v2 }
 0x3e3   :  { %v2029_v3 = vadd.f32 1.0, %v3079_v16 }
 0x3e4   :  { %3088 = vrcp.f32 %v2028_v1 }
 0x3e5   :  { %3090 = vrcp.f32 %v2029_v3 }
 0x3e6   :  { %v3081_v56 = vpop.eup %3080 }
 0x3e7   :  { %v3083_v4 = vpop.eup %3082  ;;  %2216 = vst [vmem:[%s3939_s7 + $0x1d0] sm:$0xff] %v3081_v56 }
 0x3e8   :  { %v3085_v5 = vpop.eup %3084  ;;  %2217 = vst [vmem:[%s3939_s7 + $0x1d8] sm:$0xff] %v3083_v4 }
 0x3e9   :  { %v3087_v6 = vpop.eup %3086  ;;  %2218 = vst [vmem:[%s3939_s7 + $0x1e0] sm:$0xff] %v3085_v5 }
 0x3ea   :  { %2219 = vst [vmem:[%s3939_s7 + $0x1e8] sm:$0xff] %v3087_v6 }
 0x3ee   :  { %v3089_v7 = vpop.eup %3088 }
 0x3ef   :  { %v3091_v8 = vpop.eup %3090  ;;  %2220 = vst [vmem:[%s3939_s7 + $0x1f0] sm:$0xff] %v3089_v7 }
 0x3f0   :  { %2221 = vst [vmem:[%s3939_s7 + $0x1f8] sm:$0xff] %v3091_v8 }

</bundles_post_ra>
